<compile_context>
chip_gen: v5e
topology: v5e:2x2
jax: 0.10.0
libtpu: 0.0.40
codegen_flags: <defaults>
</compile_context>

<pallas_src>
import functools

import jax
import jax.numpy as jnp
from jax.experimental import pallas as pl
from jax.experimental.pallas import tpu as pltpu


def _reorg_kernel(x_ref, o_ref, *, stride: int):
    """x_ref: (Cb, H, W) input block.  o_ref: (s*s, Cb, h*w) output block.

    o_ref[si*s + sj, c, i*w + j] = x_ref[c, i*s + si, j*s + sj]
    """
    s = stride
    Cb, H, W = x_ref.shape
    h, w = H // s, W // s

    x = x_ref[...]                          # (Cb, H, W)
    x5 = x.reshape(Cb, h, s, w, s)          # indices: (c, i, si, j, sj)
    for si in range(s):                     # static, tiny loops (s == 2 typically)
        for sj in range(s):
            y = x5[:, :, si, :, sj]         # (Cb, h, w)
            # Lane-dense store: the block's last dim is the full h*w extent.
            o_ref[si * s + sj] = y.reshape(Cb, h * w)


def _pick_channel_block(C: int, H: int, W: int, itemsize: int,
                        budget_bytes: int) -> int:
    """Largest channel block Cb (full C, or a divisor of C that is a multiple
    of 8, keeping the output block's second-to-last dim sublane-aligned) whose
    double-buffered in+out pipeline buffers fit in `budget_bytes`."""
    valid = sorted({C} | {d for d in range(8, C + 1, 8) if C % d == 0},
                   reverse=True)
    for cb in valid:
        # input block + output block (same element count), each double-buffered
        if 4 * cb * H * W * itemsize <= budget_bytes:
            return cb
    return valid[-1]  # smallest legal block; extreme shapes may still be large


def reorg(x: jax.Array, stride: int = 2) -> jax.Array:
    assert x.ndim == 4
    B, C, H, W = x.shape
    s = stride
    assert H % s == 0 and W % s == 0
    h, w = H // s, W // s

    itemsize = jnp.dtype(x.dtype).itemsize
    # Keep pipeline buffers modest so the kernel fits comfortably on v7x
    # (64 MiB VMEM) as well as v5e/v6e, with headroom for relayout scratch.
    cb = _pick_channel_block(C, H, W, itemsize, budget_bytes=16 * 1024 * 1024)
    n_cb = C // cb

    kernel = functools.partial(_reorg_kernel, stride=s)

    out4 = pl.pallas_call(
        kernel,
        # Channel-major (s*s, C) split of the output channel axis + flattened
        # (lane-dense) spatial axis; reshaped back to (B, s*s*C, h, w) below.
        out_shape=jax.ShapeDtypeStruct((B, s * s, C, h * w), x.dtype),
        grid_spec=pltpu.PrefetchScalarGridSpec(
            num_scalar_prefetch=0,
            grid=(B, n_cb),
            in_specs=[
                pl.BlockSpec((None, cb, H, W), lambda b, ci: (b, ci, 0, 0)),
            ],
            out_specs=pl.BlockSpec(
                (None, s * s, cb, h * w), lambda b, ci: (b, 0, ci, 0)
            ),
        ),
        compiler_params=pltpu.CompilerParams(
            dimension_semantics=("parallel", "parallel"),
            vmem_limit_bytes=48 * 1024 * 1024,
        ),
        cost_estimate=pl.CostEstimate(
            flops=0,
            transcendentals=0,
            bytes_accessed=2 * B * C * H * W * itemsize,
        ),
    )(x)

    # Free view back to the PyTorch layout: (B, s*s, C, h*w) -> (B, s*s*C, h, w)
    return out4.reshape(B, s * s * C, h, w)


def _reorg_reference(x: jax.Array, stride: int = 2) -> jax.Array:
    # Mirror the exact torch view/transpose sequence in plain JAX.
    s = stride
    B, C, H, W = x.shape
    h, w = H // s, W // s
    y = x.reshape(B, C, h, s, w, s)
    y = jnp.swapaxes(y, 3, 4)                      # (B, C, h, w, s, s)
    y = y.reshape(B, C, h * w, s * s)
    y = jnp.swapaxes(y, 2, 3)                      # (B, C, s*s, h*w)
    y = y.reshape(B, C, s * s, h, w)
    y = jnp.swapaxes(y, 1, 2)                      # (B, s*s, C, h, w)
    return y.reshape(B, s * s * C, h, w)


if __name__ == "__main__":
    key = jax.random.PRNGKey(0)
    B, C, H, W = 2, 4, 16, 16
    x = jax.random.normal(key, (B, C, H, W), dtype=jnp.float32)

    out = reorg(x, stride=2)
    out = jax.block_until_ready(out)

    ref = _reorg_reference(x, stride=2)
    assert out.shape == (B, 4 * C, H // 2, W // 2)
    assert jnp.allclose(out, ref), "Pallas Reorg mismatch vs reference"

    print("KERNEL_OK")
</pallas_src>

<mosaic_0001>
module attributes {stable_mosaic.version = 11 : i64} {
  func.func @_reorg_kernel(%arg0: i32, %arg1: i32, %arg2: memref<1x4x16x16xf32, #tpu.memory_space<vmem>>, %arg3: memref<1x4x4x64xf32, #tpu.memory_space<vmem>>) attributes {dimension_semantics = [#tpu.dimension_semantics<parallel>, #tpu.dimension_semantics<parallel>], iteration_bounds = array<i64: 2, 1>, scalar_prefetch = 0 : i64, scratch_operands = 0 : i64, tpu.core_type = #tpu.core_type<tc>, window_params = [{transform_indices = @transform_0, window_bounds = array<i64: 1, 4, 16, 16>}, {transform_indices = @transform_1, window_bounds = array<i64: 1, 4, 4, 64>}]} {
    %c0 = arith.constant 0 : index
    %c0_0 = arith.constant 0 : index
    %c0_1 = arith.constant 0 : index
    %c0_2 = arith.constant 0 : index
    %0 = vector.load %arg2[%c0, %c0_0, %c0_1, %c0_2] : memref<1x4x16x16xf32, #tpu.memory_space<vmem>>, vector<1x4x16x16xf32>
    %1 = vector.shape_cast %0 : vector<1x4x16x16xf32> to vector<4x16x16xf32>
    %2 = vector.shape_cast %1 : vector<4x16x16xf32> to vector<4x8x2x8x2xf32>
    %3 = vector.extract_strided_slice %2 {offsets = [0, 0, 0, 0, 0], sizes = [4, 8, 1, 8, 1], strides = [1, 1, 1, 1, 1]} : vector<4x8x2x8x2xf32> to vector<4x8x1x8x1xf32>
    %4 = vector.shape_cast %3 : vector<4x8x1x8x1xf32> to vector<4x8x8xf32>
    %5 = vector.shape_cast %4 : vector<4x8x8xf32> to vector<4x64xf32>
    %c0_3 = arith.constant 0 : index
    %c0_4 = arith.constant 0 : index
    %c0_5 = arith.constant 0 : index
    %c0_6 = arith.constant 0 : index
    %6 = vector.load %arg3[%c0_3, %c0_4, %c0_5, %c0_6] : memref<1x4x4x64xf32, #tpu.memory_space<vmem>>, vector<1x1x4x64xf32>
    %7 = vector.shape_cast %6 : vector<1x1x4x64xf32> to vector<4x64xf32>
    %8 = vector.shape_cast %5 : vector<4x64xf32> to vector<1x1x4x64xf32>
    tpu.vector_store %arg3[%c0_3, %c0_4, %c0_5, %c0_6], %8 {strides = array<i32>} : memref<1x4x4x64xf32, #tpu.memory_space<vmem>>, vector<1x1x4x64xf32>,
    %9 = vector.extract_strided_slice %2 {offsets = [0, 0, 0, 0, 1], sizes = [4, 8, 1, 8, 1], strides = [1, 1, 1, 1, 1]} : vector<4x8x2x8x2xf32> to vector<4x8x1x8x1xf32>
    %10 = vector.shape_cast %9 : vector<4x8x1x8x1xf32> to vector<4x8x8xf32>
    %11 = vector.shape_cast %10 : vector<4x8x8xf32> to vector<4x64xf32>
    %c0_7 = arith.constant 0 : index
    %c1 = arith.constant 1 : index
    %c0_8 = arith.constant 0 : index
    %c0_9 = arith.constant 0 : index
    %12 = vector.load %arg3[%c0_7, %c1, %c0_8, %c0_9] : memref<1x4x4x64xf32, #tpu.memory_space<vmem>>, vector<1x1x4x64xf32>
    %13 = vector.shape_cast %12 : vector<1x1x4x64xf32> to vector<4x64xf32>
    %14 = vector.shape_cast %11 : vector<4x64xf32> to vector<1x1x4x64xf32>
    tpu.vector_store %arg3[%c0_7, %c1, %c0_8, %c0_9], %14 {strides = array<i32>} : memref<1x4x4x64xf32, #tpu.memory_space<vmem>>, vector<1x1x4x64xf32>,
    %15 = vector.extract_strided_slice %2 {offsets = [0, 0, 1, 0, 0], sizes = [4, 8, 1, 8, 1], strides = [1, 1, 1, 1, 1]} : vector<4x8x2x8x2xf32> to vector<4x8x1x8x1xf32>
    %16 = vector.shape_cast %15 : vector<4x8x1x8x1xf32> to vector<4x8x8xf32>
    %17 = vector.shape_cast %16 : vector<4x8x8xf32> to vector<4x64xf32>
    %c0_10 = arith.constant 0 : index
    %c2 = arith.constant 2 : index
    %c0_11 = arith.constant 0 : index
    %c0_12 = arith.constant 0 : index
    %18 = vector.load %arg3[%c0_10, %c2, %c0_11, %c0_12] : memref<1x4x4x64xf32, #tpu.memory_space<vmem>>, vector<1x1x4x64xf32>
    %19 = vector.shape_cast %18 : vector<1x1x4x64xf32> to vector<4x64xf32>
    %20 = vector.shape_cast %17 : vector<4x64xf32> to vector<1x1x4x64xf32>
    tpu.vector_store %arg3[%c0_10, %c2, %c0_11, %c0_12], %20 {strides = array<i32>} : memref<1x4x4x64xf32, #tpu.memory_space<vmem>>, vector<1x1x4x64xf32>,
    %21 = vector.extract_strided_slice %2 {offsets = [0, 0, 1, 0, 1], sizes = [4, 8, 1, 8, 1], strides = [1, 1, 1, 1, 1]} : vector<4x8x2x8x2xf32> to vector<4x8x1x8x1xf32>
    %22 = vector.shape_cast %21 : vector<4x8x1x8x1xf32> to vector<4x8x8xf32>
    %23 = vector.shape_cast %22 : vector<4x8x8xf32> to vector<4x64xf32>
    %c0_13 = arith.constant 0 : index
    %c3 = arith.constant 3 : index
    %c0_14 = arith.constant 0 : index
    %c0_15 = arith.constant 0 : index
    %24 = vector.load %arg3[%c0_13, %c3, %c0_14, %c0_15] : memref<1x4x4x64xf32, #tpu.memory_space<vmem>>, vector<1x1x4x64xf32>
    %25 = vector.shape_cast %24 : vector<1x1x4x64xf32> to vector<4x64xf32>
    %26 = vector.shape_cast %23 : vector<4x64xf32> to vector<1x1x4x64xf32>
    tpu.vector_store %arg3[%c0_13, %c3, %c0_14, %c0_15], %26 {strides = array<i32>} : memref<1x4x4x64xf32, #tpu.memory_space<vmem>>, vector<1x1x4x64xf32>,
    return
  }
  func.func @transform_0(%arg0: i32, %arg1: i32) -> (i32, i32, i32, i32) {
    %c0_i32 = arith.constant 0 : i32
    %c0_i32_0 = arith.constant 0 : i32
    %c0_i32_1 = arith.constant 0 : i32
    return %arg0, %arg1, %c0_i32, %c0_i32_0 : i32, i32, i32, i32
  }
  func.func @transform_1(%arg0: i32, %arg1: i32) -> (i32, i32, i32, i32) {
    %c0_i32 = arith.constant 0 : i32
    %c0_i32_0 = arith.constant 0 : i32
    %c0_i32_1 = arith.constant 0 : i32
    return %arg0, %c0_i32, %arg1, %c0_i32_0 : i32, i32, i32, i32
  }
}

</mosaic_0001>

<bundles_post_ra>
// kernel: tpu_custom_call.1
= control target key start
LH: loop header
LB: loop body
LE: loop exit
PB: predicated region body
PF: predicated region fallthrough
CT: control target
= control target key end

     0   :  { %6 = vsyncpa [#allocation3], 0  ;;  %s4202_s0 = inlined_call_operand.hbm [shape: f32[2,4,16,16], index: 0, kind: input, shape index: {}]   ;;  %s4203_s1 = inlined_call_operand.hbm [shape: f32[2,4,4,64], index: 1, kind: output, shape index: {}]  }
   0x1   :  { %8 = vsyncpa [#allocation3 + $0x1], 0 }
   0x2   :  { %9 = vsyncpa [#allocation4], 0 }
   0x3   :  { %11 = vsyncpa [#allocation4 + $0x1], 0  ;;  %s2319_s6 = smov 0   ;;  %s2321_s7 = smov 0  }
   0x4   :  { %s2323_s8 = smov 0   ;;  %s2325_s9 = smov 0  }
   0x5   :  { %s2327_s10 = smov 0   ;;  %s2329_s11 = smov 0  }
   0x6 LB: > { %s2072_s12 = sadd.s32 4294967295, %s2292_s11   ;;  %s2073_s13 = sadd.s32 4294967294, %s2292_s11   ;;  %s2292_s11 = sphi %s2329_s11, %s17_s11   ;;  %s2288_s10 = sphi %s2327_s10, %s4428_s10   ;;  %s2284_s9 = sphi %s2325_s9, %s4427_s9   ;;  %s2280_s8 = sphi %s2323_s8, %s4426_s8   ;;  %s2276_s7 = sphi %s2321_s7, %s4425_s7   ;;  %s2272_s6 = sphi %s2319_s6, %s4424_s6  }
   0x7   : > { %s29_s14 = sadd.s32 1, %s2288_s10  ;;  %s38_s15 = sadd.s32 1, %s2280_s8 }
   0x8   : > { %p31_p0 = scmp.ge.s32.totalorder %s29_s14, 2  ;;  %p45_p1 = scmp.ne.s32.totalorder %s2280_s8, %s2276_s7 }
   0x9   : > { %p46_p2 = scmp.eq.s32.totalorder %s2292_s11, 0  ;;  %p51_p3 = scmp.ne.s32.totalorder %s2276_s7, %s2272_s6 }
   0xa   : > { %s4430_s14 = smov (%p31_p0, %s29_s14), 0  ;;  %p52_p5 = scmp.eq.s32.totalorder %s2072_s12, 0 }
   0xb   : > { %p2360_p4 = por %p46_p2, %p45_p1  ;;  %s33_s17 = ssub.s32 %s2288_s10, %s4430_s14 }
   0xc   : > { %p77_p6 = scmp.eq.s32.totalorder %s2072_s12, 1  ;;  %p36_p7 = scmp.eq.s32.totalorder %s33_s17, 0 }
   0xd   : > { %p2366_p8 = por %p52_p5, %p51_p3  ;;  %p83_p10 = scmp.eq.s32.totalorder %s2073_s13, 1 }
   0xe   : > { %p2370_p9 = por %p77_p6, %p45_p1  ;;  %p2075_p12 = scmp.ge.s32.totalorder %s2292_s11, 2 }
   0xf   : > { %s2375_s20 = scalar_select %p36_p7, %s2280_s8, %s38_s15  }
  0x10   : > { %p2377_p11 = por %p83_p10, %p51_p3  ;;  %p2104_p13 = scmp.lt.s32.totalorder %s2292_s11, 2 }
  0x11   : > { %s103_s22 = sand.u32 1, %s2280_s8   ;;  %s2090_s24 = sshll.u32 %s2288_s10, 6 }
  0x12   : > { %s2076_s23 = sshll.u32 %s103_s22, 6  ;;  %s115_s27 = scalar_lea.hbm %s4202_s0, %s2090_s24 }
  0x13   : > { %s107_s28 = scalar_lea.vmem [#allocation2], %s2076_s23  ;;  %s116_s30 = sshll.u32 %s115_s27, 4  ;;  %s117_s30 = int_to_ptr.hbm [resolvable:$true] %s116_s30 }
  0x14   : > { %s118_s29 = sshll.u32 %s107_s28, 4  ;;  %p2097_p0 = pnand %p2104_p13, %p2360_p4  ;;  %s119_s29 = int_to_ptr.vmem [resolvable:$true] %s118_s29 }
  0x15   : > { %p2079_p1 = scmp.ge.s32.totalorder %s2292_s11, 1  ;;  %s104_s2 = scalar_lea.sflag [#allocation3], %s103_s22 }
  0x16   : > { %s2294_s3 = smov 128   ;;  %s2295_s4 = smov 8  }
  0x17   : > { %2099 = dma.hbm_to_vmem [thread:$0]  (!%p2097_p0), %s117_s30, 1024, %s119_s29, %s104_s2, %s2294_s3, %s2294_s3, %s2295_s4  }
  0x18   : > { %p126_p2 = scmp.lt.s32.totalorder %s2292_s11, 3 }
  0x1a   : > { %p127_p3 = pnand %p2079_p1, %p126_p2 }
  0x1c   : > { %130 = sbr.rel (%p127_p3) target bundleno = 764 (0x2fc), region = 24 }
  0x21   : > { %s2393_s5 = sand.u32 1, %s2276_s7  }
  0x22   : > { %s2080_s12 = sshll.u32 %s2393_s5, 6  ;;  %s133_s13 = scalar_lea.sflag [#allocation3], %s2393_s5 }
  0x23   : > { %s2397_s15 = scalar_lea.vmem [#allocation2], %s2080_s12 }
  0x24   : > { %2263 = dma.done.wait (%p2366_p8), %s133_s13, 1024  }
  0x25   : > { %2265 = vsyncadd (%p2366_p8), %s133_s13, 4294966272  ;;  %v2404_v0 = vld [vmem:[%s2397_s15 + $0x20] sm:$0xff]  ;;  %v2407_v1 = vld [vmem:[%s2397_s15 + $0x10] sm:$0xff]  ;;  %s2296_s16 = smov 126   ;;  %s2297_s17 = smov 124   ;;  %vm342_vm0 = vcmask 1047556  }
  0x26   : > { %v2410_v2 = vld [vmem:[%s2397_s15] sm:$0xff]  ;;  %181 = vrot.lane.b32.xlu2 %v2404_v0, %s2296_s16  ;;  %177 = vrot.lane.b32.xlu1 %v2407_v1, %s2296_s16  ;;  %v2416_v3 = vld [vmem:[%s2397_s15 + $0x28] sm:$0xff]  ;;  %s2298_s18 = smov 122   ;;  %s2299_s22 = smov 120   ;;  %v2303_v48 = vmov 1983009808  }
  0x27   : > { %173 = vrot.lane.b32.xlu0 %v2410_v2, %s2296_s16  ;;  %v2419_v4 = vld [vmem:[%s2397_s15 + $0x18] sm:$0xff]  ;;  %v2422_v5 = vld [vmem:[%s2397_s15 + $0x8] sm:$0xff]  ;;  %v2431_v7 = vld [vmem:[%s2397_s15 + $0x30] sm:$0xff]  ;;  %s2300_s23 = smov 118   ;;  %s2301_s24 = smov 116   ;;  %v344_v46 = vrot.slane %v2410_v2, 4  ;;  %v347_v49 = vunpack.c.l.s4 %v2303_v48 }
  0x28   : > { %v2428_v6 = vld [vmem:[%s2397_s15 + $0x38] sm:$0xff]  ;;  %4277 = vst [vmem:[#allocation8_spill] sm:$0xff] %v2431_v7  ;;  %s2302_s25 = smov 114   ;;  %v680_v54 = vrot.slane %v2419_v4, 4  ;;  %v456_v58 = vrot.slane %v2422_v5, 4  ;;  %v568_v48 = vrot.slane %v2407_v1, 4 }
  0x29   : > { %v2561_v52 = vunpack.c.0.s8 %v347_v49  ;;  %v2304_v63 = vmov 1934713408   ;;  %vm1371_vm1 = vcmask 130112   ;;  %vm1375_vm2 = vcmask 195712   ;;  %s2081_s26 = sshll.u32 %s2393_s5, 4  ;;  %s2091_s28 = sshll.u32 %s2284_s9, 4 }
  0x2a   : > { %vm1379_vm3 = vcmask 261312   ;;  %vm1383_vm4 = vcmask 326912   ;;  %vm1387_vm5 = vcmask 392512   ;;  %vm1391_vm6 = vcmask 458112   ;;  %s3749_s27 = scalar_lea.vmem [#allocation5], %s2081_s26  ;;  %s1982_s30 = scalar_lea.hbm %s4203_s1, %s2091_s28 }
  0x2b   : > { %vm1395_vm7 = vcmask 523712   ;;  %vm1442_vm8 = vcmask 1041409   ;;  %vm1444_vm9 = vcmask 1042434   ;;  %vm1446_vm10 = vcmask 1043459   ;;  %s1983_s2 = sshll.u32 %s3749_s27, 4  ;;  %s1985_s3 = sshll.u32 %s1982_s30, 4  ;;  %s4156_s2 = int_to_ptr.vmem [resolvable:$true] %s1983_s2  ;;  %s1986_s3 = int_to_ptr.hbm [resolvable:$true] %s1985_s3 }
  0x2c   : > { %vm1449_vm11 = vcmask 519168   ;;  %s1970_s4 = scalar_lea.sflag [#allocation4], %s2393_s5  ;;  %s2224_s12 = sshra.s32 %s1986_s3, 4  ;;  %s2225_s12 = int_to_ptr.hbm [resolvable:$true] %s2224_s12 }
  0x2d   : > { %s2226_s13 = scalar_lea.hbm %s2225_s12, 16  ;;  %p2231_p7 = scmp.lt.s32.totalorder %s2225_s12, %s4203_s1 }
  0x2e   : > { %183 = vrot.lane.b32.xlu2 %v2416_v3, %s2296_s16  ;;  %179 = vrot.lane.b32.xlu1 %v2419_v4, %s2296_s16  ;;  %p2227_p4 = scmp.ne.s32.totalorder %s2225_s12, %s2226_s13 }
  0x2f   : > { %175 = vrot.lane.b32.xlu0 %v2422_v5, %s2296_s16 }
  0x30   : > { %p2228_p5 = pnand %p2227_p4, %p2370_p9 }
  0x32   : > { %p2229_p6 = pneg %p2228_p5 }
  0x36   : > { %187 = vrot.lane.b32.xlu1 %v2428_v6, %s2296_s16  ;;  %197 = vrot.lane.b32.xlu2 %v2410_v2, %s2297_s17 }
  0x37   : > { %185 = vrot.lane.b32.xlu0 %v2431_v7, %s2296_s16 }
  0x3e   : > { %201 = vrot.lane.b32.xlu1 %v2407_v1, %s2297_s17  ;;  %203 = vrot.lane.b32.xlu2 %v2419_v4, %s2297_s17 }
  0x3f   : > { %199 = vrot.lane.b32.xlu0 %v2422_v5, %s2297_s17 }
  0x46   : > { %207 = vrot.lane.b32.xlu1 %v2416_v3, %s2297_s17  ;;  %209 = vrot.lane.b32.xlu2 %v2431_v7, %s2297_s17 }
  0x47   : > { %205 = vrot.lane.b32.xlu0 %v2404_v0, %s2297_s17 }
  0x4e   : > { %221 = vrot.lane.b32.xlu1 %v2410_v2, %s2298_s18  ;;  %223 = vrot.lane.b32.xlu2 %v2422_v5, %s2298_s18 }
  0x4f   : > { %211 = vrot.lane.b32.xlu0 %v2428_v6, %s2297_s17  ;;  %s2230_s17 = scalar_lea.hbm %s4203_s1, 32 }
  0x50   : > { %p2232_p8 = scmp.lt.s32.totalorder %s2230_s17, %s2226_s13 }
  0x52   : > { %p2233_p10 = por %p2232_p8, %p2231_p7 }
  0x54   : > { %p2234_p13 = pnand %p2233_p10, %p2229_p6 }
  0x56   : > { %227 = vrot.lane.b32.xlu1 %v2419_v4, %s2298_s18  ;;  %229 = vrot.lane.b32.xlu2 %v2404_v0, %s2298_s18 }
  0x57   : > { %225 = vrot.lane.b32.xlu0 %v2407_v1, %s2298_s18 }
  0x5e   : > { %233 = vrot.lane.b32.xlu1 %v2431_v7, %s2298_s18  ;;  %235 = vrot.lane.b32.xlu2 %v2428_v6, %s2298_s18 }
  0x5f   : > { %231 = vrot.lane.b32.xlu0 %v2416_v3, %s2298_s18 }
  0x66   : > { %247 = vrot.lane.b32.xlu1 %v2422_v5, %s2299_s22  ;;  %249 = vrot.lane.b32.xlu2 %v2407_v1, %s2299_s22 }
  0x67   : > { %245 = vrot.lane.b32.xlu0 %v2410_v2, %s2299_s22 }
  0x6e   : > { %253 = vrot.lane.b32.xlu1 %v2404_v0, %s2299_s22  ;;  %255 = vrot.lane.b32.xlu2 %v2416_v3, %s2299_s22 }
  0x6f   : > { %251 = vrot.lane.b32.xlu0 %v2419_v4, %s2299_s22 }
  0x76   : > { %259 = vrot.lane.b32.xlu1 %v2428_v6, %s2299_s22  ;;  %269 = vrot.lane.b32.xlu2 %v2410_v2, %s2300_s23 }
  0x77   : > { %257 = vrot.lane.b32.xlu0 %v2431_v7, %s2299_s22 }
  0x7e   : > { %273 = vrot.lane.b32.xlu1 %v2407_v1, %s2300_s23  ;;  %275 = vrot.lane.b32.xlu2 %v2419_v4, %s2300_s23 }
  0x7f   : > { %271 = vrot.lane.b32.xlu0 %v2422_v5, %s2300_s23 }
  0x80   : > { %v2463_v8 = vpop.permute.xlu2 %181 }
  0x81   : > { %v804_v60 = vrot.slane %v2463_v8, 4 }
  0x86   : > { %279 = vrot.lane.b32.xlu1 %v2416_v3, %s2300_s23  ;;  %281 = vrot.lane.b32.xlu2 %v2431_v7, %s2300_s23 }
  0x87   : > { %277 = vrot.lane.b32.xlu0 %v2404_v0, %s2300_s23 }
  0x88   : > { %v2468_v9 = vpop.permute.xlu2 %183 }
  0x89   : > { %4278 = vst [vmem:[#allocation9_spill] sm:$0xff] %v2468_v9 }
  0x8e   : > { %293 = vrot.lane.b32.xlu1 %v2410_v2, %s2301_s24  ;;  %295 = vrot.lane.b32.xlu2 %v2422_v5, %s2301_s24 }
  0x8f   : > { %283 = vrot.lane.b32.xlu0 %v2428_v6, %s2300_s23 }
  0x90   : > { %v198_v10 = vpop.permute.xlu2 %197 }
  0x91   : > { %v341_v50 = vrot.slane %v198_v10, 4  ;;  %v345_v51 = vsel %vm342_vm0, %v198_v10, %v344_v46 }
  0x92   : > { %v2570_v57 = vperm.slane %v345_v51, %v2561_v52 }
  0x93   : > { %v343_v53 = vsel %vm342_vm0, %v341_v50, %v2410_v2 }
  0x94   : > { %v2577_v61 = vperm.slane %v343_v53, %v2561_v52 }
  0x96   : > { %299 = vrot.lane.b32.xlu1 %v2419_v4, %s2301_s24  ;;  %301 = vrot.lane.b32.xlu2 %v2404_v0, %s2301_s24 }
  0x97   : > { %297 = vrot.lane.b32.xlu0 %v2407_v1, %s2301_s24 }
  0x98   : > { %v2476_v11 = vpop.permute.xlu1 %177  ;;  %v2478_v12 = vpop.permute.xlu2 %203 }
  0x99   : > { %v2480_v13 = vpop.permute.xlu0 %173  ;;  %v678_v55 = vrot.slane %v2478_v12, 4 }
  0x9b   : > { %v679_v50 = vsel %vm342_vm0, %v678_v55, %v2419_v4 }
  0x9e   : > { %305 = vrot.lane.b32.xlu1 %v2431_v7, %s2301_s24  ;;  %307 = vrot.lane.b32.xlu2 %v2428_v6, %s2301_s24 }
  0x9f   : > { %303 = vrot.lane.b32.xlu0 %v2416_v3, %s2301_s24 }
  0xa0   : > { %v2485_v14 = vpop.permute.xlu1 %179  ;;  %v2487_v15 = vpop.permute.xlu2 %209 }
  0xa1   : > { %4279 = vst [vmem:[#allocation10_spill] sm:$0xff] %v2487_v15  ;;  %v2489_v16 = vpop.permute.xlu0 %175 }
  0xa2   : > { %v468_v46 = vrot.slane %v2489_v16, 4 }
  0xa6   : > { %319 = vrot.lane.b32.xlu1 %v2422_v5, %s2302_s25  ;;  %321 = vrot.lane.b32.xlu2 %v2407_v1, %s2302_s25 }
  0xa7   : > { %317 = vrot.lane.b32.xlu0 %v2410_v2, %s2302_s25  ;;  %v395_v2 = vunpack.c.l.s4 %v2304_v63  ;;  %v2607_v63 = vperm.slane %v679_v50, %v2561_v52  ;;  %v580_v50 = vrot.slane %v2476_v11, 4 }
  0xa8   : > { %v2494_v17 = vpop.permute.xlu1 %187  ;;  %v2496_v18 = vpop.permute.xlu2 %223 }
  0xa9   : > { %4280 = vst [vmem:[#allocation11_spill] sm:$0xff] %v2494_v17  ;;  %v2498_v19 = vpop.permute.xlu0 %185  ;;  %v466_v62 = vrot.slane %v2496_v18, 4  ;;  %v2604_v17 = vunpack.c.0.s8 %v395_v2 }
  0xaa   : > { %4281 = vst [vmem:[#allocation12_spill] sm:$0xff] %v2498_v19 }
  0xab   : > { %v467_v55 = vsel %vm342_vm0, %v466_v62, %v2489_v16 }
  0xae   : > { %325 = vrot.lane.b32.xlu1 %v2404_v0, %s2302_s25  ;;  %327 = vrot.lane.b32.xlu2 %v2416_v3, %s2302_s25 }
  0xaf   : > { %323 = vrot.lane.b32.xlu0 %v2419_v4, %s2302_s25 }
  0xb0   : > { %v2503_v20 = vpop.permute.xlu1 %201  ;;  %v2505_v21 = vpop.permute.xlu2 %229 }
  0xb1   : > { %v2507_v22 = vpop.permute.xlu0 %199  ;;  %v566_v51 = vrot.slane %v2503_v20, 4  ;;  %v802_v53 = vrot.slane %v2505_v21, 4 }
  0xb2   : > { %v457_v10 = vsel %vm342_vm0, %v2507_v22, %v456_v58 }
  0xb3   : > { %v803_v16 = vsel %vm342_vm0, %v802_v53, %v2463_v8  ;;  %v465_v62 = vperm.slane %v457_v10, %v2561_v52 }
  0xb6   : > { %331 = vrot.lane.b32.xlu1 %v2428_v6, %s2302_s25  ;;  %v681_v6 = vsel %vm342_vm0, %v2478_v12, %v680_v54  ;;  %v469_v12 = vsel %vm342_vm0, %v2496_v18, %v468_v46  ;;  %v454_v54 = vrot.slane %v2507_v22, 4  ;;  %v569_v18 = vsel %vm342_vm0, %v2503_v20, %v568_v48 }
  0xb7   : > { %329 = vrot.lane.b32.xlu0 %v2431_v7, %s2302_s25  ;;  %v2600_v4 = vperm.slane %v681_v6, %v2561_v52  ;;  %v805_v46 = vsel %vm342_vm0, %v2505_v21, %v804_v60  ;;  %v904_v22 = vrot.slane %v2416_v3, 4  ;;  %v477_v58 = vperm.slane %v469_v12, %v2561_v52 }
  0xb8   : > { %v2511_v23 = vpop.permute.xlu1 %207  ;;  %v2513_v24 = vpop.permute.xlu2 %235  ;;  %v567_v6 = vsel %vm342_vm0, %v566_v51, %v2407_v1  ;;  %v473_v20 = vperm.slane %v467_v55, %v2561_v52  ;;  %v455_v21 = vsel %vm342_vm0, %v454_v54, %v2422_v5  ;;  %v792_v60 = vrot.slane %v2404_v0, 4 }
  0xb9   : > { %4282 = vst [vmem:[#allocation13_spill] sm:$0xff] %v2513_v24  ;;  %v2515_v25 = vpop.permute.xlu0 %205  ;;  %v356_v51 = vrot.slane %v2480_v13, 4  ;;  %v2632_v8 = vperm.slane %v569_v18, %v2561_v52  ;;  %v2635_v10 = vperm.slane %v805_v46, %v2561_v52  ;;  %v2639_v12 = vperm.slane %v567_v6, %v2561_v52 }
  0xba   : > { %4287 = vst [vmem:[#allocation18_spill] sm:$0xff] %v2600_v4  ;;  %v2642_v5 = vperm.slane %v803_v16, %v2561_v52  ;;  %v692_v55 = vrot.slane %v2485_v14, 4  ;;  %v514_v1 = vrot.slane %v477_v58, 4  ;;  %v461_v49 = vperm.slane %v455_v21, %v2561_v52 }
  0xbb   : > { %4288 = vst [vmem:[#allocation19_spill] sm:$0xff] %v2635_v10  ;;  %v516_v18 = vrot.slane %v465_v62, 4  ;;  %v502_v46 = vrot.slane %v473_v20, 4  ;;  %v616_v24 = vrot.slane %v2639_v12, 4  ;;  %v902_v53 = vrot.slane %v2511_v23, 4 }
  0xbc   : > { %4289 = vst [vmem:[#allocation20_spill] sm:$0xff] %v2642_v5  ;;  %v515_v21 = vsel %vm342_vm0, %v514_v1, %v465_v62  ;;  %v793_v15 = vsel %vm342_vm0, %v2515_v25, %v792_v60 }
  0xbd   : > { %v503_v62 = vsel %vm342_vm0, %v502_v46, %v461_v49  ;;  %v517_v1 = vsel %vm342_vm0, %v477_v58, %v516_v18  ;;  %v2682_v46 = vperm.slane %v515_v21, %v2604_v17  ;;  %v2698_v60 = vperm.slane %v793_v15, %v2561_v52 }
  0xbf   : > { %4291 = vst [vmem:[#allocation22_spill] sm:$0xff] %v2698_v60 }
  0xc0   : > { %v2517_v26 = vpop.permute.xlu1 %221  ;;  %v2519_v27 = vpop.permute.xlu2 %249 }
  0xc1   : > { %v2521_v28 = vpop.permute.xlu0 %211  ;;  %v354_v54 = vrot.slane %v2517_v26, 4  ;;  %v357_v16 = vsel %vm342_vm0, %v2517_v26, %v356_v51  ;;  %v905_v26 = vsel %vm342_vm0, %v2511_v23, %v904_v22  ;;  %v790_v51 = vrot.slane %v2515_v25, 4 }
  0xc2   : > { %4283 = vst [vmem:[#allocation14_spill] sm:$0xff] %v2521_v28  ;;  %v365_v5 = vperm.slane %v357_v16, %v2561_v52  ;;  %v504_v23 = vrot.slane %v461_v49, 4  ;;  %v2686_v25 = vsel %vm342_vm0, %v902_v53, %v2416_v3  ;;  %v2689_v58 = vperm.slane %v905_v26, %v2561_v52 }
  0xc3   : > { %v355_v6 = vsel %vm342_vm0, %v354_v54, %v2480_v13  ;;  %v791_v49 = vsel %vm342_vm0, %v790_v51, %v2404_v0  ;;  %v2704_v3 = vperm.slane %v503_v62, %v2604_v17 }
  0xc4   : > { %v361_v22 = vperm.slane %v355_v6, %v2561_v52  ;;  %v402_v53 = vrot.slane %v365_v5, 4  ;;  %v505_v51 = vsel %vm342_vm0, %v473_v20, %v504_v23  ;;  %v2719_v62 = vperm.slane %v791_v49, %v2561_v52 }
  0xc5   : > { %4292 = vst [vmem:[#allocation23_spill] sm:$0xff] %v2704_v3 }
  0xc6   : > { %v390_v0 = vrot.slane %v361_v22, 4  ;;  %4293 = vst [vmem:[#allocation24_spill] sm:$0xff] %v2719_v62 }
  0xc8   : > { %v2523_v29 = vpop.permute.xlu1 %227  ;;  %v2525_v30 = vpop.permute.xlu2 %255 }
  0xc9   : > { %v2527_v31 = vpop.permute.xlu0 %225  ;;  %v693_v15 = vsel %vm342_vm0, %v2523_v29, %v692_v55 }
  0xca   : > { %v578_v7 = vrot.slane %v2527_v31, 4  ;;  %v581_v6 = vsel %vm342_vm0, %v2527_v31, %v580_v50 }
  0xcc   : > { %v579_v13 = vsel %vm342_vm0, %v578_v7, %v2476_v11  ;;  %v690_v7 = vrot.slane %v2523_v29, 4  ;;  %v2693_v11 = vperm.slane %v517_v1, %v2604_v17  ;;  %v4294_v1 = vrot.slane %v2570_v57, 4 }
  0xcd   : > { %v2701_v18 = vperm.slane %v579_v13, %v2561_v52  ;;  %v589_v13 = vperm.slane %v581_v6, %v2561_v52  ;;  %v403_v6 = vsel %vm342_vm0, %v402_v53, %v2570_v57  ;;  %v2764_v57 = vperm.slane %v505_v51, %v2604_v17 }
  0xce   : > { %4290 = vst [vmem:[#allocation21_spill] sm:$0xff] %v2693_v11  ;;  %v691_v31 = vsel %vm342_vm0, %v690_v7, %v2485_v14  ;;  %v2737_v14 = vperm.slane %v693_v15, %v2561_v52  ;;  %v4298_v7 = vrot.slane %v2577_v61, 4 }
  0xcf   : > { %4300 = vst [vmem:[#allocation29_spill] sm:$0xff] %v2764_v57 }
  0xd0   : > { %v2529_v32 = vpop.permute.xlu1 %233  ;;  %v2531_v33 = vpop.permute.xlu2 %269  ;;  %4296 = vst [vmem:[#allocation26_spill] sm:$0xff] %v2737_v14  ;;  %v393_v49 = vsel %vm342_vm0, %v361_v22, %v4298_v7 }
  0xd1   : > { %4284 = vst [vmem:[#allocation15_spill] sm:$0xff] %v2529_v32  ;;  %v2533_v34 = vpop.permute.xlu0 %231  ;;  %v4217_v32 = vmov 0  }
  0xd2   : > { %2171 = vset.pattern.permute.xlu1 %v4217_v32  ;;  %2170 = vset.pattern.permute.xlu0 %v4217_v32 }
  0xd3   : > { %2169 = vset.pattern.permute.xlu2 %v4217_v32 }
  0xd8   : > { %v2535_v35 = vpop.permute.xlu1 %247  ;;  %v2537_v36 = vpop.permute.xlu2 %275 }
  0xd9   : > { %v2539_v37 = vpop.permute.xlu0 %245 }
  0xe0   : > { %v2541_v38 = vpop.permute.xlu1 %253  ;;  %v2543_v39 = vpop.permute.xlu2 %281 }
  0xe1   : > { %4285 = vst [vmem:[#allocation16_spill] sm:$0xff] %v2543_v39  ;;  %v2545_v40 = vpop.permute.xlu0 %251 }
  0xe8   : > { %v2547_v41 = vpop.permute.xlu1 %259  ;;  %v2549_v42 = vpop.permute.xlu2 %295 }
  0xe9   : > { %v2551_v43 = vpop.permute.xlu0 %257 }
  0xea   : > { %4286 = vst [vmem:[#allocation17_spill] sm:$0xff] %v2551_v43  ;;  %v1040_v50 = vrot.slane %v2551_v43, 4 }
  0xf0   : > { %v2553_v44 = vpop.permute.xlu1 %273  ;;  %v2558_v47 = vpop.permute.xlu2 %301 }
  0xf1   : > { %v2555_v45 = vpop.permute.xlu0 %271 }
  0xf8   : > { %v2567_v56 = vpop.permute.xlu1 %279  ;;  %v2590_v28 = vpop.permute.xlu2 %307 }
  0xf9   : > { %v2573_v59 = vpop.permute.xlu0 %277 }
 0x100   : > { %v2620_v2 = vpop.permute.xlu1 %293  ;;  %v2653_v19 = vpop.permute.xlu2 %321 }
 0x101   : > { %v2627_v48 = vpop.permute.xlu0 %283  ;;  %v602_v54 = vrot.slane %v2653_v19, 4 }
 0x103   : > { %v603_v16 = vsel %vm342_vm0, %v602_v54, %v2553_v44  ;;  %v617_v54 = vsel %vm342_vm0, %v2701_v18, %v616_v24  ;;  %v366_v24 = vrot.slane %v2620_v2, 4 }
 0x104   : > { %v2729_v29 = vperm.slane %v603_v16, %v2561_v52  ;;  %v697_v16 = vperm.slane %v691_v31, %v2561_v52  ;;  %v2761_v22 = vperm.slane %v617_v54, %v2604_v17  ;;  %v2768_v31 = vperm.slane %v393_v49, %v2604_v17 }
 0x105   : > { %v4305_v49 = vrot.slane %v2600_v4, 4  ;;  %v380_v4 = vrot.slane %v2531_v33, 4 }
 0x106   : > { %v726_v53 = vrot.slane %v697_v16, 4 }
 0x108   : > { %v2667_v10 = vpop.permute.xlu1 %299 }
 0x109   : > { %v2677_v32 = vpop.permute.xlu0 %297 }
 0x10a   : > { %v590_v39 = vrot.slane %v2677_v32, 4 }
 0x10c   : > { %v591_v21 = vsel %vm342_vm0, %v590_v39, %v2519_v27  ;;  %v405_v39 = vsel %vm342_vm0, %v365_v5, %v4294_v1 }
 0x10d   : > { %v2715_v26 = vperm.slane %v591_v21, %v2561_v52  ;;  %v391_v21 = vsel %vm342_vm0, %v390_v0, %v2577_v61  ;;  %v2758_v1 = vperm.slane %v405_v39, %v2604_v17  ;;  %v2771_v61 = vperm.slane %v403_v6, %v2604_v17 }
 0x10e   : > { %v4302_v0 = vrot.slane %v2632_v8, 4  ;;  %v4303_v39 = vrot.slane %v2468_v9, 4  ;;  %v2781_v51 = vperm.slane %v391_v21, %v2604_v17  ;;  %v2790_v6 = vsel %vm342_vm0, %v2737_v14, %v4305_v49 }
 0x10f   : > { %v640_v55 = vrot.slane %v2715_v26, 4  ;;  %4299 = vst [vmem:[#allocation28_spill] sm:$0xff] %v2758_v1  ;;  %v614_v21 = vrot.slane %v2701_v18, 4  ;;  %v668_v49 = vrot.slane %v2761_v22, 4 }
 0x110   : > { %v2732_v20 = vpop.permute.xlu1 %305  ;;  %4301 = vst [vmem:[#allocation30_spill] sm:$0xff] %v2771_v61  ;;  %v917_v54 = vsel %vm342_vm0, %v2533_v34, %v4303_v39 }
 0x111   : > { %4295 = vst [vmem:[#allocation25_spill] sm:$0xff] %v2732_v20  ;;  %v2741_v23 = vsel %vm342_vm0, %v2732_v20, %v1040_v50  ;;  %v2743_v5 = vpop.permute.xlu0 %303  ;;  %v641_v15 = vsel %vm342_vm0, %v2729_v29, %v640_v55  ;;  %v629_v55 = vsel %vm342_vm0, %v589_v13, %v4302_v0  ;;  %v626_v50 = vrot.slane %v589_v13, 4 }
 0x112   : > { %4297 = vst [vmem:[#allocation27_spill] sm:$0xff] %v2741_v23  ;;  %v2784_v7 = vperm.slane %v641_v15, %v2604_v17  ;;  %v367_v0 = vsel %vm342_vm0, %v366_v24, %v2539_v37  ;;  %v4306_v23 = vrot.slane %v2607_v63, 4  ;;  %v492_v15 = vrot.slane %v2555_v45, 4 }
 0x113   : > { %4304 = vst [vmem:[#allocation31_spill] sm:$0xff] %v2781_v51  ;;  %v2802_v43 = vperm.slane %v629_v55, %v2604_v17  ;;  %v2807_v13 = vperm.slane %v917_v54, %v2561_v52  ;;  %v480_v24 = vrot.slane %v2535_v35, 4  ;;  %v368_v20 = vrot.slane %v2539_v37, 4 }
 0x114   : > { %v2797_v39 = vsel %vm342_vm0, %v697_v16, %v4306_v23  ;;  %v373_v16 = vperm.slane %v367_v0, %v2561_v52  ;;  %v2815_v55 = vsel %vm342_vm0, %v2784_v7, %v668_v49  ;;  %v627_v49 = vsel %vm342_vm0, %v626_v50, %v2632_v8 }
 0x115   : > { %4307 = vst [vmem:[#allocation32_spill] sm:$0xff] %v2797_v39  ;;  %v369_v14 = vsel %vm342_vm0, %v2620_v2, %v368_v20  ;;  %v478_v39 = vrot.slane %v2549_v42, 4  ;;  %v481_v2 = vsel %vm342_vm0, %v2549_v42, %v480_v24  ;;  %v727_v50 = vsel %vm342_vm0, %v726_v53, %v2607_v63 }
 0x116   : > { %4308 = vst [vmem:[#allocation33_spill] sm:$0xff] %v2807_v13  ;;  %v416_v20 = vrot.slane %v373_v16, 4  ;;  %v2844_v42 = vperm.slane %v627_v49, %v2604_v17  ;;  %v615_v49 = vsel %vm342_vm0, %v614_v21, %v2639_v12 }
 0x117   : > { %4309 = vst [vmem:[#allocation34_spill] sm:$0xff] %v2815_v55  ;;  %v479_v24 = vsel %vm342_vm0, %v478_v39, %v2535_v35 }
 0x118   : > { %v320_v23 = vpop.permute.xlu1 %319 }
 0x119   : > { %v490_v18 = vrot.slane %v320_v23, 4  ;;  %v493_v9 = vsel %vm342_vm0, %v320_v23, %v492_v15  ;;  %v318_v62 = vpop.permute.xlu0 %317  ;;  %v962_v23 = vrot.slane %v2807_v13, 4 }
 0x11a   : > { %v2820_v54 = vperm.slane %v493_v9, %v2561_v52  ;;  %v378_v60 = vrot.slane %v318_v62, 4  ;;  %v381_v37 = vsel %vm342_vm0, %v318_v62, %v380_v4  ;;  %v377_v62 = vperm.slane %v369_v14, %v2561_v52 }
 0x11b   : > { %v491_v0 = vsel %vm342_vm0, %v490_v18, %v2555_v45  ;;  %v389_v15 = vperm.slane %v381_v37, %v2561_v52  ;;  %v1152_v37 = vrot.slane %v2547_v41, 4 }
 0x11c   : > { %v2833_v9 = vperm.slane %v491_v0, %v2561_v52  ;;  %v379_v4 = vsel %vm342_vm0, %v378_v60, %v2531_v33  ;;  %v538_v8 = vrot.slane %v2820_v54, 4  ;;  %v489_v0 = vperm.slane %v481_v2, %v2561_v52 }
 0x11d   : > { %v385_v45 = vperm.slane %v379_v4, %v2561_v52  ;;  %v426_v18 = vrot.slane %v389_v15, 4  ;;  %v1153_v35 = vsel %vm342_vm0, %v2590_v28, %v1152_v37  ;;  %v963_v2 = vsel %vm342_vm0, %v962_v23, %v2689_v58 }
 0x11e   : > { %v526_v4 = vrot.slane %v2833_v9, 4  ;;  %v428_v37 = vrot.slane %v377_v62, 4  ;;  %v2881_v12 = vperm.slane %v1153_v35, %v2561_v52  ;;  %v2885_v23 = vperm.slane %v615_v49, %v2604_v17 }
 0x11f   : > { %v414_v33 = vrot.slane %v385_v45, 4  ;;  %v417_v60 = vsel %vm342_vm0, %v385_v45, %v416_v20  ;;  %v427_v14 = vsel %vm342_vm0, %v426_v18, %v377_v62  ;;  %v485_v20 = vperm.slane %v479_v24, %v2561_v52 }
 0x120   : > { %v2852_v55 = vpop.permute.xlu1 %325  ;;  %v2855_v13 = vperm.slane %v417_v60, %v2604_v17  ;;  %v2858_v63 = vperm.slane %v427_v14, %v2604_v17  ;;  %v539_v18 = vsel %vm342_vm0, %v538_v8, %v489_v0  ;;  %v2873_v60 = vperm.slane %v727_v50, %v2604_v17 }
 0x121   : > { %v2862_v53 = vpop.permute.xlu0 %323  ;;  %v415_v39 = vsel %vm342_vm0, %v414_v33, %v373_v16  ;;  %v527_v21 = vsel %vm342_vm0, %v526_v4, %v485_v20  ;;  %v2888_v8 = vperm.slane %v963_v2, %v2604_v17  ;;  %v429_v50 = vsel %vm342_vm0, %v389_v15, %v428_v37 }
 0x122   : > { %4310 = vst [vmem:[#allocation35_spill] sm:$0xff] %v2858_v63  ;;  %v442_v45 = vrot.slane %v2855_v13, 4  ;;  %v714_v14 = vrot.slane %v2862_v53, 4  ;;  %v446_v16 = vrot.slane %v2858_v63, 4  ;;  %v2878_v33 = vperm.slane %v415_v39, %v2604_v17 }
 0x123   : > { %v2897_v39 = vperm.slane %v539_v18, %v2604_v17  ;;  %v540_v4 = vrot.slane %v489_v0, 4  ;;  %v604_v15 = vrot.slane %v2553_v44, 4  ;;  %v1164_v37 = vrot.slane %v2627_v48, 4 }
 0x124   : > { %4311 = vst [vmem:[#allocation36_spill] sm:$0xff] %v2878_v33  ;;  %v2894_v24 = vsel %vm342_vm0, %v442_v45, %v2768_v31  ;;  %v2903_v49 = vsel %vm342_vm0, %v446_v16, %v2771_v61  ;;  %v438_v2 = vrot.slane %v2878_v33, 4  ;;  %v715_v45 = vsel %vm342_vm0, %v714_v14, %v2537_v36 }
 0x125   : > { %4312 = vst [vmem:[#allocation37_spill] sm:$0xff] %v2894_v24  ;;  %1274 = vperm.xlu0 %2170, %v2894_v24   ;;  %1277 = vperm.xlu1 %2171, %v2903_v49   ;;  %v2912_v18 = vperm.slane %v527_v21, %v2604_v17  ;;  %v1150_v0 = vrot.slane %v2590_v28, 4  ;;  %v1212_v35 = vrot.slane %v2881_v12, 4  ;;  %v2921_v44 = vperm.slane %v429_v50, %v2604_v17 }
 0x126   : > { %v2918_v16 = vsel %vm342_vm0, %v438_v2, %v2781_v51  ;;  %v702_v33 = vrot.slane %v2667_v10, 4  ;;  %v558_v63 = vrot.slane %v2897_v39, 4  ;;  %v605_v28 = vsel %vm342_vm0, %v2653_v19, %v604_v15 }
 0x127   : > { %4313 = vst [vmem:[#allocation38_spill] sm:$0xff] %v2912_v18  ;;  %1271 = vperm.xlu2 %2169, %v2918_v16   ;;  %v2930_v61 = vperm.slane %v715_v45, %v2561_v52  ;;  %v550_v50 = vrot.slane %v2912_v18, 4  ;;  %v704_v51 = vrot.slane %v2545_v40, 4  ;;  %v528_v24 = vrot.slane %v485_v20, 4 }
 0x128   : > { %4314 = vst [vmem:[#allocation39_spill] sm:$0xff] %v2918_v16  ;;  %v332_v62 = vpop.permute.xlu1 %331  ;;  %v613_v20 = vperm.slane %v605_v28, %v2561_v52  ;;  %v703_v16 = vsel %vm342_vm0, %v702_v33, %v2545_v40 }
 0x129   : > { %4315 = vst [vmem:[#allocation40_spill] sm:$0xff] %v2921_v44  ;;  %v1162_v14 = vrot.slane %v332_v62, 4  ;;  %v1165_v21 = vsel %vm342_vm0, %v332_v62, %v1164_v37  ;;  %v541_v62 = vsel %vm342_vm0, %v2820_v54, %v540_v4  ;;  %v4316_v37 = vrot.slane %v2519_v27, 4 }
 0x12a   : > { %v1173_v2 = vperm.slane %v1165_v21, %v2561_v52  ;;  %v450_v21 = vrot.slane %v2921_v44, 4  ;;  %v2953_v54 = vsel %vm342_vm0, %v558_v63, %v2682_v46  ;;  %v529_v27 = vsel %vm342_vm0, %v2833_v9, %v528_v24 }
 0x12b   : > { %v593_v19 = vsel %vm342_vm0, %v2677_v32, %v4316_v37  ;;  %v1163_v15 = vsel %vm342_vm0, %v1162_v14, %v2627_v48  ;;  %4317 = vst [vmem:[#allocation41_spill] sm:$0xff] %v2953_v54  ;;  %v1151_v32 = vsel %vm342_vm0, %v1150_v0, %v2547_v41  ;;  %v2959_v48 = vpop.permute.xlu2 %327  ;;  %v2965_v4 = vsel %vm342_vm0, %v550_v50, %v2704_v3 }
 0x12c   : > { %v2945_v45 = vsel %vm342_vm0, %v1173_v2, %v1212_v35  ;;  %v750_v35 = vrot.slane %v2930_v61, 4  ;;  %v2968_v40 = vperm.slane %v541_v62, %v2604_v17  ;;  %v940_v63 = vrot.slane %v2567_v56, 4 }
 0x12d   : > { %1289 = vperm.xlu0 %2170, %v2953_v54   ;;  %v705_v9 = vsel %vm342_vm0, %v2667_v10, %v704_v51  ;;  %v601_v41 = vperm.slane %v593_v19, %v2561_v52  ;;  %v1169_v33 = vperm.slane %v1163_v15, %v2561_v52  ;;  %1283 = vperm.xlu1 %2171, %v2965_v4   ;;  %v828_v24 = vrot.slane %v2573_v59, 4  ;;  %v4349_v54 = vld [vmem:[#allocation12_spill] sm:$0xff] }
 0x12e   : > { %4318 = vst [vmem:[#allocation42_spill] sm:$0xff] %v2968_v40  ;;  %v709_v0 = vperm.slane %v703_v16, %v2561_v52  ;;  %v2980_v14 = vsel %vm342_vm0, %v450_v21, %v2758_v1  ;;  %v2983_v28 = vperm.slane %v529_v27, %v2604_v17  ;;  %v1157_v50 = vperm.slane %v1151_v32, %v2561_v52  ;;  %v4346_v1 = vld [vmem:[#allocation9_spill] sm:$0xff] }
 0x12f   : > { %v650_v10 = vrot.slane %v613_v20, 4  ;;  %v941_v51 = vsel %vm342_vm0, %v2959_v48, %v940_v63  ;;  %1280 = vperm.xlu2 %2169, %v2980_v14   ;;  %v666_v62 = vrot.slane %v2784_v7, 4  ;;  %v638_v37 = vrot.slane %v2729_v29, 4 }
 0x130   : > { %4319 = vst [vmem:[#allocation43_spill] sm:$0xff] %v2983_v28  ;;  %v2992_v16 = vperm.slane %v705_v9, %v2561_v52  ;;  %v562_v19 = vrot.slane %v2968_v40, 4  ;;  %v751_v15 = vsel %vm342_vm0, %v750_v35, %v709_v0  ;;  %v4320_v27 = vrot.slane %v2537_v36, 4 }
 0x131   : > { %v651_v21 = vsel %vm342_vm0, %v650_v10, %v601_v41  ;;  %v1198_v63 = vrot.slane %v1169_v33, 4  ;;  %v1210_v44 = vrot.slane %v1173_v2, 4  ;;  %v3002_v7 = vperm.slane %v941_v51, %v2561_v52 }
 0x132   : > { %v717_v32 = vsel %vm342_vm0, %v2862_v53, %v4320_v27  ;;  %v652_v29 = vrot.slane %v601_v41, 4  ;;  %v826_v9 = vrot.slane %v2852_v55, 4  ;;  %v554_v18 = vrot.slane %v2983_v28, 4 }
 0x133   : > { %v4321_v40 = vrot.slane %v2525_v30, 4  ;;  %v3012_v36 = vsel %vm342_vm0, %v666_v62, %v2761_v22  ;;  %v3015_v53 = vperm.slane %v751_v15, %v2604_v17  ;;  %v639_v2 = vsel %vm342_vm0, %v638_v37, %v2715_v26 }
 0x134   : > { %4322 = vst [vmem:[#allocation44_spill] sm:$0xff] %v3012_v36  ;;  %v1200_v41 = vrot.slane %v1157_v50, 4  ;;  %v3020_v10 = vperm.slane %v717_v32, %v2561_v52  ;;  %v3025_v51 = vsel %vm342_vm0, %v562_v19, %v2693_v11  ;;  %v764_v22 = vrot.slane %v2992_v16, 4 }
 0x135   : > { %v929_v35 = vsel %vm342_vm0, %v2743_v5, %v4321_v40  ;;  %1298 = vperm.xlu0 %2170, %v3012_v36   ;;  %v657_v40 = vperm.slane %v651_v21, %v2604_v17  ;;  %v829_v62 = vsel %vm342_vm0, %v2852_v55, %v828_v24  ;;  %1292 = vperm.xlu1 %2171, %v3025_v51   ;;  %v752_v24 = vrot.slane %v709_v0, 4 }
 0x136   : > { %v3034_v26 = vsel %vm342_vm0, %v1210_v44, %v2881_v12  ;;  %v3037_v37 = vsel %vm342_vm0, %v1198_v63, %v1157_v50  ;;  %v3040_v15 = vperm.slane %v929_v35, %v2561_v52  ;;  %v827_v19 = vsel %vm342_vm0, %v826_v9, %v2573_v59 }
 0x137   : > { %v3046_v21 = vsel %vm342_vm0, %v554_v18, %v2764_v57  ;;  %v645_v55 = vperm.slane %v639_v2, %v2604_v17  ;;  %v986_v27 = vrot.slane %v3002_v7, 4  ;;  %v774_v12 = vrot.slane %v3015_v53, 4 }
 0x138   : > { %1286 = vperm.xlu2 %2169, %v3046_v21   ;;  %v653_v44 = vsel %vm342_vm0, %v613_v20, %v652_v29  ;;  %v926_v50 = vrot.slane %v2743_v5, 4  ;;  %v3055_v32 = vperm.slane %v829_v62, %v2561_v52  ;;  %v765_v59 = vsel %vm342_vm0, %v3020_v10, %v764_v22 }
 0x139   : > { %v670_v18 = vrot.slane %v657_v40, 4  ;;  %v3060_v63 = vperm.slane %v827_v19, %v2561_v52  ;;  %v753_v0 = vsel %vm342_vm0, %v2930_v61, %v752_v24  ;;  %v3065_v9 = vsel %vm342_vm0, %v1169_v33, %v1200_v41 }
 0x13a   : > { %v672_v20 = vrot.slane %v2844_v42, 4  ;;  %v4323_v5 = vrot.slane %v2541_v38, 4  ;;  %v987_v35 = vsel %vm342_vm0, %v986_v27, %v3040_v15  ;;  %v662_v2 = vrot.slane %v645_v55, 4 }
 0x13b   : > { %v676_v22 = vrot.slane %v2802_v43, 4  ;;  %v4324_v62 = vrot.slane %v2558_v47, 4  ;;  %v3081_v33 = vsel %vm342_vm0, %v774_v12, %v2873_v60  ;;  %v3084_v41 = vperm.slane %v765_v59, %v2604_v17 }
 0x13c   : > { %v817_v29 = vsel %vm342_vm0, %v2558_v47, %v4323_v5  ;;  %4325 = vst [vmem:[#allocation45_spill] sm:$0xff] %v3081_v33  ;;  %v661_v19 = vperm.slane %v653_v44, %v2604_v17  ;;  %v927_v24 = vsel %vm342_vm0, %v926_v50, %v2525_v30  ;;  %v874_v27 = vrot.slane %v3055_v32, 4 }
 0x13d   : > { %v815_v61 = vsel %vm342_vm0, %v4324_v62, %v2541_v38  ;;  %1307 = vperm.xlu0 %2170, %v3081_v33   ;;  %v3093_v47 = vsel %vm342_vm0, %v670_v18, %v2844_v42  ;;  %v3096_v38 = vperm.slane %v753_v0, %v2604_v17  ;;  %v862_v12 = vrot.slane %v3060_v63, 4  ;;  %v3108_v18 = vpop.permute.xlu0 %329 }
 0x13e   : > { %1301 = vperm.xlu1 %2171, %v3093_v47   ;;  %v3101_v44 = vperm.slane %v987_v35, %v2604_v17  ;;  %v664_v30 = vrot.slane %v2885_v23, 4  ;;  %v1008_v50 = vrot.slane %v2888_v8, 4  ;;  %v821_v59 = vperm.slane %v815_v61, %v2561_v52 }
 0x13f   : > { %4326 = vst [vmem:[#allocation46_spill] sm:$0xff] %v3096_v38  ;;  %v825_v5 = vperm.slane %v817_v29, %v2561_v52  ;;  %v938_v42 = vrot.slane %v2959_v48, 4  ;;  %v3112_v0 = vsel %vm342_vm0, %v662_v2, %v2885_v23  ;;  %v3115_v62 = vperm.slane %v927_v24, %v2561_v52 }
 0x140   : > { %v762_v35 = vrot.slane %v3020_v10, 4  ;;  %1295 = vperm.xlu2 %2169, %v3112_v0   ;;  %v786_v28 = vrot.slane %v3084_v41, 4  ;;  %v3121_v61 = vsel %vm342_vm0, %v657_v40, %v672_v20  ;;  %v778_v48 = vrot.slane %v3096_v38, 4 }
 0x141   : > { %4327 = vst [vmem:[#allocation47_spill] sm:$0xff] %v3121_v61  ;;  %v875_v29 = vsel %vm342_vm0, %v874_v27, %v825_v5  ;;  %v3126_v57 = vsel %vm342_vm0, %v645_v55, %v664_v30  ;;  %v3129_v23 = vsel %vm342_vm0, %v661_v19, %v676_v22  ;;  %v1050_v2 = vrot.slane %v3108_v18, 4  ;;  %v4331_v22 = vld [vmem:[#allocation32_spill] sm:$0xff] }
 0x142   : > { %4328 = vst [vmem:[#allocation48_spill] sm:$0xff] %v3126_v57  ;;  %v3134_v10 = vperm.slane %v2790_v6, %v2604_v17  ;;  %v863_v24 = vsel %vm342_vm0, %v862_v12, %v821_v59  ;;  %v3139_v40 = vsel %vm342_vm0, %v3101_v44, %v1008_v50  ;;  %v3143_v20 = vperm.slane %v2686_v25, %v2561_v52  ;;  %v4340_v57 = vld [vmem:[#allocation24_spill] sm:$0xff] }
 0x143   : > { %4329 = vst [vmem:[#allocation49_spill] sm:$0xff] %v3129_v23  ;;  %v914_v55 = vrot.slane %v2533_v34, 4  ;;  %v3148_v27 = vperm.slane %v4331_v22, %v2604_v17  ;;  %v674_v30 = vrot.slane %v661_v19, 4  ;;  %v939_v6 = vsel %vm342_vm0, %v938_v42, %v2567_v56  ;;  %v4341_v61 = vld [vmem:[#allocation20_spill] sm:$0xff] }
 0x144   : > { %4330 = vst [vmem:[#allocation50_spill] sm:$0xff] %v3139_v40  ;;  %v3154_v12 = vsel %vm342_vm0, %v786_v28, %v3134_v10  ;;  %v3157_v50 = vperm.slane %v875_v29, %v2604_v17  ;;  %v763_v25 = vsel %vm342_vm0, %v762_v35, %v2992_v16  ;;  %v4334_v40 = vld [vmem:[#allocation22_spill] sm:$0xff]  ;;  %v976_v23 = vrot.slane %v3115_v62, 4  ;;  %v4337_v29 = vld [vmem:[#allocation16_spill] sm:$0xff]  ;;  %v4338_v16 = vld [vmem:[#allocation19_spill] sm:$0xff] }
 0x145   : > { %4332 = vst [vmem:[#allocation32_spill] sm:$0xff] %v3148_v27  ;;  %v852_v34 = vrot.slane %v4334_v40, 4  ;;  %1316 = vperm.xlu0 %2170, %v3154_v12   ;;  %v3166_v19 = vsel %vm342_vm0, %v778_v48, %v3148_v27  ;;  %v3169_v56 = vperm.slane %v863_v24, %v2604_v17  ;;  %v4336_v28 = vld [vmem:[#allocation26_spill] sm:$0xff]  ;;  %v1051_v22 = vsel %vm342_vm0, %v1050_v2, %v4337_v29  ;;  %v4343_v27 = vld [vmem:[#allocation15_spill] sm:$0xff] }
 0x146   : > { %4333 = vst [vmem:[#allocation51_spill] sm:$0xff] %v3154_v12  ;;  %v738_v42 = vrot.slane %v4336_v28, 4  ;;  %1310 = vperm.xlu1 %2171, %v3166_v19   ;;  %v4339_v35 = vrot.slane %v4338_v16, 4  ;;  %v4342_v12 = vrot.slane %v4341_v61, 4  ;;  %v1026_v24 = vrot.slane %v4343_v27, 4 }
 0x147   : > { %4335 = vst [vmem:[#allocation22_spill] sm:$0xff] %v3169_v56  ;;  %v945_v11 = vperm.slane %v939_v6, %v2561_v52  ;;  %v3187_v28 = vsel %vm342_vm0, %v674_v30, %v2802_v43  ;;  %v3190_v2 = vperm.slane %v763_v25, %v2604_v17  ;;  %v915_v33 = vsel %vm342_vm0, %v914_v55, %v4346_v1  ;;  %v4348_v55 = vld [vmem:[#allocation18_spill] sm:$0xff] }
 0x148   : > { %v851_v38 = vsel %vm342_vm0, %v4339_v35, %v4334_v40  ;;  %v839_v48 = vsel %vm342_vm0, %v4342_v12, %v4340_v57  ;;  %4344 = vst [vmem:[#allocation26_spill] sm:$0xff] %v3187_v28  ;;  %v876_v40 = vrot.slane %v825_v5, 4  ;;  %v4347_v35 = vld [vmem:[#allocation25_spill] sm:$0xff]  ;;  %1304 = vperm.xlu2 %2169, %v3187_v28   ;;  %v894_v12 = vrot.slane %v3157_v50, 4 }
 0x149   : > { %4345 = vst [vmem:[#allocation16_spill] sm:$0xff] %v3190_v2  ;;  %v1038_v3 = vrot.slane %v4347_v35, 4  ;;  %v952_v36 = vrot.slane %v3143_v20, 4  ;;  %v3199_v6 = vperm.slane %v1051_v22, %v2561_v52  ;;  %v886_v43 = vrot.slane %v3169_v56, 4 }
 0x14a   : > { %v977_v30 = vsel %vm342_vm0, %v945_v11, %v976_v23  ;;  %v864_v25 = vrot.slane %v821_v59, 4  ;;  %v877_v1 = vsel %vm342_vm0, %v3055_v32, %v876_v40  ;;  %v3206_v5 = vperm.slane %v851_v38, %v2604_v17  ;;  %v4351_v23 = vld [vmem:[#allocation17_spill] sm:$0xff] }
 0x14b   : > { %v739_v35 = vsel %vm342_vm0, %v738_v42, %v4348_v55  ;;  %v1027_v28 = vsel %vm342_vm0, %v1026_v24, %v4349_v54  ;;  %v3213_v22 = vperm.slane %v915_v33, %v2561_v52  ;;  %v3216_v56 = vperm.slane %v839_v48, %v2604_v17 }
 0x14c   : > { %v782_v59 = vrot.slane %v3190_v2, 4  ;;  %v1039_v32 = vsel %vm342_vm0, %v1038_v3, %v4351_v23  ;;  %v3223_v38 = vsel %vm342_vm0, %v894_v12, %v3206_v5  ;;  %v3226_v42 = vperm.slane %v977_v30, %v2604_v17  ;;  %v4357_v23 = vld [vmem:[#allocation10_spill] sm:$0xff] }
 0x14d   : > { %4350 = vst [vmem:[#allocation19_spill] sm:$0xff] %v3216_v56  ;;  %v865_v24 = vsel %vm342_vm0, %v3060_v63, %v864_v25  ;;  %v1086_v33 = vrot.slane %v3199_v6, 4  ;;  %1325 = vperm.xlu0 %2170, %v3223_v38   ;;  %v3234_v48 = vsel %vm342_vm0, %v886_v43, %v3216_v56  ;;  %v3237_v3 = vperm.slane %v739_v35, %v2604_v17  ;;  %v4356_v35 = vld [vmem:[#allocation8_spill] sm:$0xff] }
 0x14e   : > { %4352 = vst [vmem:[#allocation24_spill] sm:$0xff] %v3223_v38  ;;  %v3240_v40 = vperm.slane %v877_v1, %v2604_v17  ;;  %v840_v12 = vrot.slane %v4340_v57, 4  ;;  %v3244_v30 = vperm.slane %v1027_v28, %v2561_v52  ;;  %1319 = vperm.xlu1 %2171, %v3234_v48   ;;  %v1045_v63 = vperm.slane %v1039_v32, %v2561_v52 }
 0x14f   : > { %4353 = vst [vmem:[#allocation20_spill] sm:$0xff] %v3237_v3  ;;  %v3250_v25 = vsel %vm342_vm0, %v782_v59, %v3237_v3  ;;  %v953_v43 = vsel %vm342_vm0, %v3213_v22, %v952_v36  ;;  %v3255_v55 = vperm.slane %v865_v24, %v2604_v17  ;;  %v1052_v1 = vrot.slane %v4337_v29, 4 }
 0x150   : > { %4354 = vst [vmem:[#allocation15_spill] sm:$0xff] %v3240_v40  ;;  %1313 = vperm.xlu2 %2169, %v3250_v25   ;;  %v1002_v57 = vrot.slane %v3226_v42, 4  ;;  %v853_v28 = vsel %vm342_vm0, %v4338_v16, %v852_v34  ;;  %v4358_v32 = vrot.slane %v4357_v23, 4  ;;  %v4359_v2 = vrot.slane %v4356_v35, 4 }
 0x151   : > { %4355 = vst [vmem:[#allocation9_spill] sm:$0xff] %v3255_v55  ;;  %v898_v24 = vrot.slane %v3240_v40, 4  ;;  %v1087_v29 = vsel %vm342_vm0, %v1086_v33, %v1045_v63  ;;  %v974_v3 = vrot.slane %v945_v11, 4  ;;  %v1053_v56 = vsel %vm342_vm0, %v3108_v18, %v1052_v1 }
 0x152   : > { %v1015_v59 = vsel %vm342_vm0, %v4358_v32, %v4356_v35  ;;  %v1017_v36 = vsel %vm342_vm0, %v4357_v23, %v4359_v2  ;;  %v3275_v34 = vperm.slane %v953_v43, %v2604_v17  ;;  %v841_v16 = vsel %vm342_vm0, %v4341_v61, %v840_v12  ;;  %v4360_v35 = vld [vmem:[#allocation27_spill] sm:$0xff] }
 0x153   : > { %v1062_v32 = vrot.slane %v3244_v30, 4  ;;  %v3282_v38 = vperm.slane %v4360_v35, %v2561_v52  ;;  %v3285_v2 = vperm.slane %v853_v28, %v2604_v17  ;;  %v890_v11 = vrot.slane %v3255_v55, 4  ;;  %v4364_v55 = vld [vmem:[#allocation13_spill] sm:$0xff] }
 0x154   : > { %v3290_v18 = vsel %vm342_vm0, %v1002_v57, %v3275_v34  ;;  %v3293_v33 = vperm.slane %v1087_v29, %v2604_v17  ;;  %v975_v61 = vsel %vm342_vm0, %v974_v3, %v3115_v62  ;;  %v1021_v12 = vperm.slane %v1015_v59, %v2561_v52 }
 0x155   : > { %4361 = vst [vmem:[#allocation25_spill] sm:$0xff] %v3285_v2  ;;  %v3299_v43 = vperm.slane %v1053_v56, %v2561_v52  ;;  %1334 = vperm.xlu0 %2170, %v3290_v18   ;;  %v3304_v1 = vsel %vm342_vm0, %v898_v24, %v3285_v2  ;;  %v3307_v57 = vperm.slane %v841_v16, %v2604_v17  ;;  %v1028_v62 = vrot.slane %v4349_v54, 4  ;;  %v2179_v16 = vld [vmem:[%s2397_s15 + $0x38] sm:$0xff] }
 0x156   : > { %4362 = vst [vmem:[#allocation18_spill] sm:$0xff] %v3290_v18  ;;  %v3310_v28 = vperm.slane %v1017_v36, %v2561_v52  ;;  %v950_v3 = vrot.slane %v3213_v22, 4  ;;  %1328 = vperm.xlu1 %2171, %v3304_v1   ;;  %v1100_v56 = vrot.slane %v3282_v38, 4  ;;  %v1063_v59 = vsel %vm342_vm0, %v1062_v32, %v1021_v12  ;;  %v4365_v2 = vld [vmem:[#allocation11_spill] sm:$0xff] }
 0x157   : > { %4363 = vst [vmem:[#allocation12_spill] sm:$0xff] %v3307_v57  ;;  %v3318_v23 = vsel %vm342_vm0, %v890_v11, %v3307_v57  ;;  %v3322_v24 = vperm.slane %v975_v61, %v2604_v17  ;;  %v1029_v36 = vsel %vm342_vm0, %v4343_v27, %v1028_v62  ;;  %v1088_v29 = vrot.slane %v1045_v63, 4 }
 0x158   : > { %v988_v54 = vrot.slane %v3040_v15, 4  ;;  %1322 = vperm.xlu2 %2169, %v3318_v23   ;;  %v1110_v22 = vrot.slane %v3293_v33, 4  ;;  %v1128_v35 = vrot.slane %v2179_v16, 4  ;;  %v1101_v11 = vsel %vm342_vm0, %v3299_v43, %v1100_v56 }
 0x159   : > { %v1006_v32 = vrot.slane %v3101_v44, 4  ;;  %v1138_v61 = vrot.slane %v4364_v55, 4  ;;  %v3335_v57 = vperm.slane %v1063_v59, %v2604_v17  ;;  %v951_v27 = vsel %vm342_vm0, %v950_v3, %v3143_v20 }
 0x15a   : > { %v1089_v15 = vsel %vm342_vm0, %v3199_v6, %v1088_v29  ;;  %v1064_v63 = vrot.slane %v1021_v12, 4  ;;  %v1076_v62 = vrot.slane %v3310_v28, 4  ;;  %v1037_v40 = vperm.slane %v1029_v36, %v2561_v52  ;;  %v4366_v6 = vld [vmem:[#allocation14_spill] sm:$0xff] }
 0x15b   : > { %v998_v56 = vrot.slane %v3322_v24, 4  ;;  %v1140_v44 = vrot.slane %v4365_v2, 4  ;;  %v3347_v18 = vsel %vm342_vm0, %v1110_v22, %v3335_v57  ;;  %v3350_v59 = vperm.slane %v1101_v11, %v2604_v17 }
 0x15c   : > { %v989_v20 = vsel %vm342_vm0, %v3002_v7, %v988_v54  ;;  %v1126_v12 = vrot.slane %v4366_v6, 4  ;;  %v3358_v3 = vsel %vm342_vm0, %v1006_v32, %v2888_v8  ;;  %v3361_v36 = vperm.slane %v951_v27, %v2604_v17 }
 0x15d   : > { %1343 = vperm.xlu0 %2170, %v3347_v18   ;;  %v3364_v29 = vperm.slane %v1089_v15, %v2604_v17  ;;  %v1139_v22 = vsel %vm342_vm0, %v1138_v61, %v4365_v2  ;;  %v1141_v7 = vsel %vm342_vm0, %v4364_v55, %v1140_v44  ;;  %v964_v54 = vrot.slane %v2689_v58, 4 }
 0x15e   : > { %1337 = vperm.xlu1 %2171, %v3358_v3   ;;  %v3374_v8 = vsel %vm342_vm0, %v998_v56, %v3361_v36  ;;  %v1077_v11 = vsel %vm342_vm0, %v1037_v40, %v1076_v62  ;;  %v3378_v32 = vperm.slane %v989_v20, %v2604_v17  ;;  %v1129_v27 = vsel %vm342_vm0, %v4366_v6, %v1128_v35  ;;  %v4367_v35 = vld [vmem:[#allocation33_spill] sm:$0xff] }
 0x15f   : > { %v1098_v2 = vrot.slane %v3299_v43, 4  ;;  %v1122_v55 = vrot.slane %v3350_v59, 4  ;;  %v1065_v58 = vsel %vm342_vm0, %v3244_v30, %v1064_v63  ;;  %v1149_v61 = vperm.slane %v1141_v7, %v2561_v52 }
 0x160   : > { %1331 = vperm.xlu2 %2169, %v3374_v8   ;;  %v1127_v15 = vsel %vm342_vm0, %v1126_v12, %v2179_v16  ;;  %v1114_v62 = vrot.slane %v3364_v29, 4  ;;  %v1145_v56 = vperm.slane %v1139_v22, %v2561_v52  ;;  %v3392_v44 = vperm.slane %v1077_v11, %v2604_v17 }
 0x161   : > { %v965_v43 = vsel %vm342_vm0, %v4367_v35, %v964_v54  ;;  %v1137_v20 = vperm.slane %v1129_v27, %v2561_v52  ;;  %v3398_v6 = vperm.slane %v1065_v58, %v2604_v17  ;;  %v1010_v30 = vrot.slane %v3378_v32, 4 }
 0x162   : > { %v1133_v63 = vperm.slane %v1127_v15, %v2561_v52  ;;  %v3404_v16 = vsel %vm342_vm0, %v1122_v55, %v3392_v44  ;;  %v3408_v12 = vperm.slane %v3034_v26, %v2604_v17  ;;  %v1099_v22 = vsel %vm342_vm0, %v1098_v2, %v3282_v38 }
 0x163   : > { %v1186_v7 = vrot.slane %v1149_v61, 4  ;;  %v3415_v54 = vsel %vm342_vm0, %v1114_v62, %v3398_v6  ;;  %v3418_v52 = vperm.slane %v965_v43, %v2604_v17  ;;  %v3422_v11 = vperm.slane %v3037_v37, %v2604_v17 }
 0x164   : > { %v1174_v27 = vrot.slane %v1145_v56, 4  ;;  %v1074_v26 = vrot.slane %v1037_v40, 4  ;;  %v3431_v55 = vperm.slane %v1099_v22, %v2604_v17  ;;  %v1230_v58 = vrot.slane %v3408_v12, 4 }
 0x165   : > { %1352 = vperm.xlu0 %2170, %v3404_v16   ;;  %v3427_v38 = vsel %vm342_vm0, %v1010_v30, %v3418_v52  ;;  %v1187_v2 = vsel %vm342_vm0, %v1186_v7, %v1137_v20  ;;  %v1222_v15 = vrot.slane %v3422_v11, 4  ;;  %v1188_v30 = vrot.slane %v1137_v20, 4 }
 0x166   : > { %1346 = vperm.xlu1 %2171, %v3415_v54   ;;  %v1175_v37 = vsel %vm342_vm0, %v1174_v27, %v1133_v63  ;;  %v3438_v40 = vperm.slane %v1187_v2, %v2604_v17  ;;  %v1075_v62 = vsel %vm342_vm0, %v1074_v26, %v3310_v28  ;;  %v1118_v43 = vrot.slane %v3431_v55, 4 }
 0x167   : > { %v3443_v35 = vperm.slane %v1175_v37, %v2604_v17  ;;  %v3456_v27 = vperm.slane %v1075_v62, %v2604_v17  ;;  %v3460_v28 = vperm.slane %v2945_v45, %v2604_v17  ;;  %v1176_v26 = vrot.slane %v1133_v63, 4 }
 0x168   : > { %1340 = vperm.xlu2 %2169, %v3427_v38   ;;  %v3448_v22 = vsel %vm342_vm0, %v1230_v58, %v3438_v40  ;;  %v3469_v2 = vperm.slane %v3065_v9, %v2604_v17  ;;  %v1189_v58 = vsel %vm342_vm0, %v1149_v61, %v1188_v30  ;;  %v444_v45 = vrot.slane %v2768_v31, 4 }
 0x169   : > { %v3453_v7 = vsel %vm342_vm0, %v1222_v15, %v3443_v35  ;;  %v3465_v20 = vsel %vm342_vm0, %v1118_v43, %v3456_v27  ;;  %v1234_v37 = vrot.slane %v3460_v28, 4  ;;  %v1177_v63 = vsel %vm342_vm0, %v1145_v56, %v1176_v26 }
 0x16a   : > { %v3477_v15 = vperm.slane %v1189_v58, %v2604_v17  ;;  %v1226_v62 = vrot.slane %v3469_v2, 4  ;;  %v3482_v43 = vsel %vm342_vm0, %v2855_v13, %v444_v45  ;;  %v3490_v61 = vperm.slane %v1177_v63, %v2604_v17  ;;  %v4368_v17 = vld [vmem:[#allocation39_spill] sm:$0xff]  ;;  %v4369_v58 = vld [vmem:[#allocation34_spill] sm:$0xff] }
 0x16b   : > { %v560_v13 = vrot.slane %v2682_v46, 4  ;;  %v4264_v30 = vmov 1  }
 0x16c   : > { %v3487_v9 = vsel %vm342_vm0, %v1234_v37, %v3477_v15  ;;  %v3495_v31 = vsel %vm342_vm0, %v1226_v62, %v3490_v61 }
 0x16d   : > { %1361 = vperm.xlu0 %2170, %v3448_v22   ;;  %v3501_v56 = vsel %vm342_vm0, %v2897_v39, %v560_v13  ;;  %v776_v39 = vrot.slane %v2873_v60, 4 }
 0x16e   : > { %1355 = vperm.xlu1 %2171, %v3453_v7  }
 0x16f   : > { %v3514_v37 = vsel %vm342_vm0, %v3015_v53, %v776_v39 }
 0x170   : > { %1349 = vperm.xlu2 %2169, %v3465_v20  }
 0x175   : > { %1649 = vperm.xlu0 %2170, %v3482_v43  }
 0x176   : > { %1364 = vperm.xlu1 %2171, %v3487_v9  }
 0x178   : > { %1358 = vperm.xlu2 %2169, %v3495_v31  }
 0x17d   : > { %1664 = vperm.xlu0 %2170, %v3501_v56  }
 0x17e   : > { %2173 = vset.pattern.permute.xlu1 %v4264_v30 }
 0x17f   : > { %1458 = vperm.xlu1 %2173, %v2903_v49   ;;  %v1366_v49 = vlaneseq }
 0x180   : > { %2172 = vset.pattern.permute.xlu2 %v4264_v30 }
 0x181   : > { %1452 = vperm.xlu2 %2172, %v4368_v17   ;;  %v1272_v26 = vpop.permute.xlu2 %1271  ;;  %v3519_v45 = vand.u32 127, %v1366_v49 }
 0x183   : > { %v3527_v60 = vadd.s32 4294967288, %v3519_v45  ;;  %v3531_v53 = vadd.s32 4294967280, %v3519_v45 }
 0x185   : > { %1673 = vperm.xlu0 %2170, %v4369_v58  }
 0x187   : > { %1464 = vperm.xlu1 %2173, %v2965_v4   ;;  %v788_v4 = vrot.slane %v3134_v10, 4  ;;  %v1368_v10 = vperm.slane %v1272_v26, %v3519_v45 }
 0x189   : > { %1461 = vperm.xlu2 %2172, %v2980_v14   ;;  %v1281_v46 = vpop.permute.xlu2 %1280  ;;  %v3524_v14 = vsel %vm342_vm0, %v3084_v41, %v788_v4 }
 0x18a   : > { %4370 = vst [vmem:[#allocation17_spill] sm:$0xff] %v3524_v14 }
 0x18d   : > { %1682 = vperm.xlu0 %2170, %v3514_v37  }
 0x18f   : > { %1473 = vperm.xlu1 %2173, %v3025_v51   ;;  %v3534_v51 = vadd.s32 4294967272, %v3519_v45 }
 0x191   : > { %1467 = vperm.xlu2 %2172, %v3046_v21   ;;  %v1378_v17 = vperm.slane %v1281_v46, %v3534_v51  ;;  %v3557_v46 = vadd.s32 4294967256, %v3519_v45 }
 0x192   : > { %v1287_v63 = vpop.permute.xlu2 %1286 }
 0x195   : > { %1691 = vperm.xlu0 %2170, %v3524_v14   ;;  %v4385_v14 = vld [vmem:[#allocation36_spill] sm:$0xff] }
 0x197   : > { %1482 = vperm.xlu1 %2173, %v3093_v47   ;;  %v1275_v21 = vpop.permute.xlu0 %1274  ;;  %v1278_v62 = vpop.permute.xlu1 %1277  ;;  %v896_v47 = vrot.slane %v3206_v5, 4  ;;  %v3561_v5 = vadd.s32 4294967248, %v3519_v45 }
 0x198   : > { %v1370_v41 = vperm.slane %v1275_v21, %v3527_v60  ;;  %v1374_v13 = vperm.slane %v1278_v62, %v3531_v53  ;;  %v4372_v62 = vld [vmem:[#allocation26_spill] sm:$0xff] }
 0x199   : > { %1476 = vperm.xlu2 %2172, %v3112_v0   ;;  %v3549_v26 = vsel %vm342_vm0, %v3157_v50, %v896_v47  ;;  %v3554_v0 = vadd.s32 4294967264, %v3519_v45 }
 0x19a   : > { %v1372_v39 = vsel %vm1371_vm1, %v1370_v41, %v1368_v10  ;;  %v3543_v49 = vpop.permute.xlu2 %1295  ;;  %4371 = vst [vmem:[#allocation8_spill] sm:$0xff] %v3549_v26 }
 0x19b   : > { %v1376_v4 = vsel %vm1375_vm2, %v1374_v13, %v1372_v39  ;;  %v1386_v13 = vperm.slane %v1287_v63, %v3557_v46  ;;  %v1004_v39 = vrot.slane %v3275_v34, 4 }
 0x19c   : > { %v1380_v21 = vsel %vm1379_vm3, %v1378_v17, %v1376_v4 }
 0x19d   : > { %1700 = vperm.xlu0 %2170, %v3549_v26   ;;  %v3574_v30 = vsel %vm342_vm0, %v3226_v42, %v1004_v39 }
 0x19e   : > { %4373 = vst [vmem:[#allocation10_spill] sm:$0xff] %v3574_v30 }
 0x19f   : > { %1491 = vperm.xlu1 %2173, %v3166_v19   ;;  %v1290_v10 = vpop.permute.xlu0 %1289  ;;  %v1284_v41 = vpop.permute.xlu1 %1283 }
 0x1a0   : > { %v1382_v50 = vperm.slane %v1284_v41, %v3554_v0  ;;  %v1390_v19 = vperm.slane %v1290_v10, %v3561_v5 }
 0x1a1   : > { %1485 = vperm.xlu2 %2172, %v4372_v62  }
 0x1a2   : > { %v3566_v17 = vpop.permute.xlu2 %1304  ;;  %v1384_v47 = vsel %vm1383_vm4, %v1382_v50, %v1380_v21  ;;  %v1112_v21 = vrot.slane %v3335_v57, 4 }
 0x1a3   : > { %v1388_v4 = vsel %vm1387_vm5, %v1386_v13, %v1384_v47 }
 0x1a4   : > { %v3578_v41 = vsel %vm1391_vm6, %v1390_v19, %v1388_v4  ;;  %v3589_v42 = vsel %vm342_vm0, %v3293_v33, %v1112_v21  ;;  %v4377_v19 = vmov 1   ;;  %v4379_v4 = vld [vmem:[#allocation41_spill] sm:$0xff] }
 0x1a5   : > { %1709 = vperm.xlu0 %2170, %v3574_v30   ;;  %4374 = vst [vmem:[#allocation27_spill] sm:$0xff] %v3589_v42  ;;  %v4384_v30 = vld [vmem:[#allocation31_spill] sm:$0xff] }
 0x1a7   : > { %1500 = vperm.xlu1 %2173, %v3234_v48   ;;  %v1299_v63 = vpop.permute.xlu0 %1298  ;;  %v3581_v34 = vpop.permute.xlu1 %1292 }
 0x1a9   : > { %1494 = vperm.xlu2 %2172, %v3250_v25   ;;  %v1124_v25 = vrot.slane %v3392_v44, 4 }
 0x1aa   : > { %v3584_v10 = vpop.permute.xlu2 %1313 }
 0x1ab   : > { %v3599_v13 = vsel %vm342_vm0, %v3350_v59, %v1124_v25  ;;  %v1398_v25 = vperm.slane %v1299_v63, %v3527_v60  ;;  %v440_v63 = vrot.slane %v4384_v30, 4  ;;  %v1402_v30 = vperm.slane %v3566_v17, %v3534_v51 }
 0x1ac   : > { %4375 = vst [vmem:[#allocation13_spill] sm:$0xff] %v3599_v13 }
 0x1ad   : > { %1718 = vperm.xlu0 %2170, %v3589_v42   ;;  %v4383_v42 = vld [vmem:[#allocation35_spill] sm:$0xff] }
 0x1af   : > { %1509 = vperm.xlu1 %2173, %v3304_v1   ;;  %v3593_v50 = vpop.permute.xlu0 %1307 }
 0x1b0   : > { %v1302_v48 = vpop.permute.xlu1 %1301 }
 0x1b1   : > { %1503 = vperm.xlu2 %2172, %v3318_v23   ;;  %v1232_v23 = vrot.slane %v3438_v40, 4 }
 0x1b2   : > { %v1323_v62 = vpop.permute.xlu2 %1322 }
 0x1b3   : > { %v3613_v44 = vsel %vm342_vm0, %v3408_v12, %v1232_v23  ;;  %v4380_v23 = vld [vmem:[#allocation30_spill] sm:$0xff] }
 0x1b4   : > { %4376 = vst [vmem:[#allocation11_spill] sm:$0xff] %v3613_v44 }
 0x1b5   : > { %1727 = vperm.xlu0 %2170, %v3599_v13  }
 0x1b7   : > { %1518 = vperm.xlu1 %2173, %v3358_v3   ;;  %v3603_v33 = vpop.permute.xlu0 %1316 }
 0x1b8   : > { %v3605_v57 = vpop.permute.xlu1 %1310 }
 0x1b9   : > { %1512 = vperm.xlu2 %2172, %v3374_v8   ;;  %v4378_v8 = vld [vmem:[#allocation37_spill] sm:$0xff] }
 0x1ba   : > { %v3608_v1 = vpop.permute.xlu2 %1331 }
 0x1bd   : > { %1736 = vperm.xlu0 %2170, %v3613_v44   ;;  %v4381_v44 = vld [vmem:[#allocation44_spill] sm:$0xff] }
 0x1bf   : > { %1527 = vperm.xlu1 %2173, %v3415_v54   ;;  %v1326_v59 = vpop.permute.xlu0 %1325 }
 0x1c0   : > { %v1320_v3 = vpop.permute.xlu1 %1319 }
 0x1c1   : > { %1521 = vperm.xlu2 %2172, %v3427_v38  }
 0x1c2   : > { %v3618_v39 = vpop.permute.xlu2 %1340 }
 0x1c5   : > { %2176 = vset.pattern.permute.xlu0 %v4377_v19 }
 0x1c6   : > { %1455 = vperm.xlu0 %2176, %v4378_v8   ;;  %v448_v8 = vrot.slane %v4380_v23, 4  ;;  %v1413_v23 = vperm.slane %v1323_v62, %v3527_v60 }
 0x1c7   : > { %1536 = vperm.xlu1 %2173, %v3453_v7   ;;  %v3623_v40 = vpop.permute.xlu0 %1334  ;;  %v1400_v7 = vperm.slane %v1302_v48, %v3531_v53 }
 0x1c8   : > { %v1329_v12 = vpop.permute.xlu1 %1328 }
 0x1c9   : > { %1530 = vperm.xlu2 %2172, %v3465_v20   ;;  %v1397_v20 = vperm.slane %v3543_v49, %v3519_v45 }
 0x1ca   : > { %v1350_v47 = vpop.permute.xlu2 %1349 }
 0x1cb   : > { %v1399_v48 = vsel %vm1371_vm1, %v1398_v25, %v1397_v20  ;;  %v1417_v25 = vperm.slane %v1329_v12, %v3534_v51  ;;  %v1406_v20 = vperm.slane %v3605_v57, %v3557_v46  ;;  %v1419_v57 = vperm.slane %v3608_v1, %v3554_v0 }
 0x1ce   : > { %1470 = vperm.xlu0 %2176, %v4379_v4   ;;  %v1412_v4 = vperm.slane %v1320_v3, %v3519_v45  ;;  %v1401_v3 = vsel %vm1375_vm2, %v1400_v7, %v1399_v48  ;;  %v4387_v48 = vld [vmem:[#allocation45_spill] sm:$0xff] }
 0x1cf   : > { %1545 = vperm.xlu1 %2173, %v3487_v9   ;;  %v1344_v54 = vpop.permute.xlu0 %1343  ;;  %v4382_v9 = vmov 0  }
 0x1d0   : > { %v3628_v38 = vpop.permute.xlu1 %1337  ;;  %v1414_v62 = vsel %vm1371_vm1, %v1413_v23, %v1412_v4  ;;  %v1427_v7 = vperm.slane %v1344_v54, %v3519_v45  ;;  %v1430_v54 = vperm.slane %v1350_v47, %v3531_v53  ;;  %v4388_v23 = vld [vmem:[#allocation28_spill] sm:$0xff] }
 0x1d1   : > { %1539 = vperm.xlu2 %2172, %v3495_v31   ;;  %v3643_v31 = vsel %vm342_vm0, %v4383_v42, %v448_v8  ;;  %v3655_v42 = vsel %vm342_vm0, %v4385_v14, %v440_v63  ;;  %v1403_v8 = vsel %vm1379_vm3, %v1402_v30, %v1401_v3  ;;  %v1404_v14 = vperm.slane %v3593_v50, %v3554_v0  ;;  %v4389_v30 = vld [vmem:[#allocation38_spill] sm:$0xff] }
 0x1d2   : > { %v3631_v21 = vpop.permute.xlu2 %1358 }
 0x1d3   : > { %v1405_v3 = vsel %vm1383_vm4, %v1404_v14, %v1403_v8  ;;  %v1423_v14 = vperm.slane %v3628_v38, %v3561_v5 }
 0x1d6   : > { %1479 = vperm.xlu0 %2176, %v4381_v44   ;;  %v1415_v44 = vperm.slane %v1326_v59, %v3531_v53 }
 0x1d7   : > { %2175 = vset.pattern.permute.xlu1 %v4382_v9  ;;  %v1353_v13 = vpop.permute.xlu0 %1352 }
 0x1d8   : > { %1652 = vperm.xlu1 %2175, %v3643_v31   ;;  %v1347_v49 = vpop.permute.xlu1 %1346  ;;  %v1416_v17 = vsel %vm1375_vm2, %v1415_v44, %v1414_v62  ;;  %v1407_v62 = vsel %vm1387_vm5, %v1406_v20, %v1405_v3  ;;  %v1408_v20 = vperm.slane %v3584_v10, %v3561_v5  ;;  %v1436_v3 = vperm.slane %v3631_v21, %v3557_v46 }
 0x1d9   : > { %v1428_v26 = vperm.slane %v1347_v49, %v3527_v60  ;;  %2174 = vset.pattern.permute.xlu2 %v4382_v9  ;;  %v4386_v9 = vld [vmem:[#allocation23_spill] sm:$0xff]  ;;  %v1418_v63 = vsel %vm1379_vm3, %v1417_v25, %v1416_v17  ;;  %v452_v49 = vrot.slane %v4388_v23, 4  ;;  %v1432_v17 = vperm.slane %v1353_v13, %v3534_v51 }
 0x1da   : > { %1646 = vperm.xlu2 %2174, %v3655_v42   ;;  %v552_v12 = vrot.slane %v4386_v9, 4  ;;  %v1420_v1 = vsel %vm1383_vm4, %v1419_v57, %v1418_v63  ;;  %v1409_v63 = vsel %vm1391_vm6, %v1408_v20, %v1407_v62  ;;  %v4393_v62 = vld [vmem:[#allocation29_spill] sm:$0xff]  ;;  %v4395_v20 = vld [vmem:[#allocation43_spill] sm:$0xff] }
 0x1db   : > { %v3663_v59 = vpop.permute.xlu2 %1452  ;;  %v1429_v4 = vsel %vm1371_vm1, %v1428_v26, %v1427_v7  ;;  %v3685_v26 = vadd.s32 4294967240, %v3519_v45  ;;  %v4390_v7 = vld [vmem:[#allocation40_spill] sm:$0xff] }
 0x1dc   : > { %v3682_v44 = vsel %vm342_vm0, %v4389_v30, %v552_v12  ;;  %v1431_v47 = vsel %vm1375_vm2, %v1430_v54, %v1429_v4  ;;  %v3692_v8 = vsel %vm342_vm0, %v4390_v7, %v452_v49  ;;  %v1421_v4 = vperm.slane %v3623_v40, %v3557_v46  ;;  %v4392_v30 = vld [vmem:[#allocation51_spill] sm:$0xff] }
 0x1dd   : > { %v1433_v12 = vsel %vm1379_vm3, %v1432_v17, %v1431_v47  ;;  %v1394_v10 = vperm.slane %v3581_v34, %v3685_v26  ;;  %v1410_v40 = vperm.slane %v3603_v33, %v3685_v26  ;;  %v1425_v57 = vperm.slane %v3618_v39, %v3685_v26  ;;  %v4394_v33 = vld [vmem:[#allocation42_spill] sm:$0xff] }
 0x1de   : > { %1488 = vperm.xlu0 %2176, %v4387_v48   ;;  %v1422_v38 = vsel %vm1387_vm5, %v1421_v4, %v1420_v1  ;;  %v4391_v48 = vld [vmem:[#allocation21_spill] sm:$0xff]  ;;  %v556_v47 = vrot.slane %v4393_v62, 4  ;;  %v4400_v62 = vld [vmem:[#allocation18_spill] sm:$0xff] }
 0x1df   : > { %v1362_v50 = vpop.permute.xlu0 %1361  ;;  %v564_v23 = vrot.slane %v4391_v48, 4  ;;  %v1424_v49 = vsel %vm1391_vm6, %v1423_v14, %v1422_v38  ;;  %v1396_v17 = vsel %vm1395_vm7, %v1394_v10, %v3578_v41  ;;  %v4396_v48 = vld [vmem:[#allocation24_spill] sm:$0xff]  ;;  %v4397_v10 = vld [vmem:[#allocation47_spill] sm:$0xff] }
 0x1e0   : > { %1658 = vperm.xlu1 %2175, %v3682_v44   ;;  %v1356_v25 = vpop.permute.xlu1 %1355  ;;  %v1426_v21 = vsel %vm1395_vm7, %v1425_v57, %v1424_v49  ;;  %v1438_v39 = vperm.slane %v1362_v50, %v3561_v5  ;;  %v3739_v4 = vsel %vm342_vm0, %v4395_v20, %v556_v47  ;;  %v4398_v49 = vld [vmem:[#allocation48_spill] sm:$0xff]  ;;  %v4404_v20 = vld [vmem:[#allocation22_spill] sm:$0xff] }
 0x1e1   : > { %v1434_v9 = vperm.slane %v1356_v25, %v3554_v0  ;;  %v1411_v25 = vsel %vm1395_vm7, %v1410_v40, %v1409_v63  ;;  %v3728_v1 = vsel %vm342_vm0, %v4394_v33, %v564_v23  ;;  %v4399_v57 = vld [vmem:[#allocation32_spill] sm:$0xff] }
 0x1e2   : > { %1655 = vperm.xlu2 %2174, %v3692_v8   ;;  %v1443_v63 = vsel %vm1442_vm8, %v1411_v25, %v1396_v17  ;;  %v4401_v25 = vld [vmem:[#allocation46_spill] sm:$0xff] }
 0x1e3   : > { %v3705_v54 = vpop.permute.xlu2 %1461  ;;  %v1435_v13 = vsel %vm1383_vm4, %v1434_v9, %v1433_v12  ;;  %v1445_v50 = vsel %vm1444_vm9, %v1426_v21, %v1443_v63  ;;  %v4402_v21 = vld [vmem:[#allocation49_spill] sm:$0xff]  ;;  %v4405_v63 = vld [vmem:[#allocation20_spill] sm:$0xff] }
 0x1e4   : > { %v1437_v34 = vsel %vm1387_vm5, %v1436_v3, %v1435_v13 }
 0x1e5   : > { %v1439_v12 = vsel %vm1391_vm6, %v1438_v39, %v1437_v34 }
 0x1e6   : > { %1497 = vperm.xlu0 %2176, %v4392_v30   ;;  %v780_v30 = vrot.slane %v4399_v57, 4 }
 0x1e7   : > { %v3724_v7 = vpop.permute.xlu0 %1649 }
 0x1e8   : > { %1667 = vperm.xlu1 %2175, %v3728_v1   ;;  %v1365_v14 = vpop.permute.xlu1 %1364  ;;  %v3768_v34 = vsel %vm342_vm0, %v4401_v25, %v780_v30  ;;  %v4409_v25 = vld [vmem:[#allocation15_spill] sm:$0xff] }
 0x1e9   : > { %v1440_v9 = vperm.slane %v1365_v14, %v3685_v26  ;;  %v4403_v14 = vld [vmem:[#allocation19_spill] sm:$0xff] }
 0x1ea   : > { %1661 = vperm.xlu2 %2174, %v3739_v4   ;;  %v888_v17 = vrot.slane %v4403_v14, 4 }
 0x1eb   : > { %v1441_v38 = vsel %vm1395_vm7, %v1440_v9, %v1439_v12  ;;  %v3746_v13 = vpop.permute.xlu2 %1467 }
 0x1ec   : > { %v1447_v41 = vsel %vm1446_vm10, %v1441_v38, %v1445_v50  ;;  %v3782_v12 = vsel %vm342_vm0, %v4404_v20, %v888_v17  ;;  %v784_v50 = vrot.slane %v4405_v63, 4  ;;  %v4410_v17 = vld [vmem:[#allocation12_spill] sm:$0xff] }
 0x1ed   : > { %1450 = vst.msk [vmem:[%s3749_s27] sm:$0xf] %vm1449_vm11, %v1447_v41  ;;  %v4406_v41 = vld [vmem:[#allocation16_spill] sm:$0xff]  ;;  %v892_v20 = vrot.slane %v4410_v17, 4 }
 0x1ee   : > { %1506 = vperm.xlu0 %2176, %v4396_v48   ;;  %v3790_v48 = vsel %vm342_vm0, %v4406_v41, %v784_v50  ;;  %v4411_v50 = vld [vmem:[#allocation9_spill] sm:$0xff] }
 0x1ef   : > { %v3754_v23 = vpop.permute.xlu0 %1664  ;;  %v3809_v41 = vsel %vm342_vm0, %v4411_v50, %v892_v20  ;;  %v1116_v50 = vrot.slane %v3398_v6, 4 }
 0x1f0   : > { %1676 = vperm.xlu1 %2175, %v4397_v10  }
 0x1f1   : > { %v3757_v40 = vpop.permute.xlu1 %1458 }
 0x1f2   : > { %1670 = vperm.xlu2 %2174, %v4398_v49  }
 0x1f3   : > { %v3760_v3 = vpop.permute.xlu2 %1476 }
 0x1f6   : > { %1515 = vperm.xlu0 %2176, %v4400_v62  }
 0x1f7   : > { %v3764_v47 = vpop.permute.xlu0 %1673 }
 0x1f8   : > { %1685 = vperm.xlu1 %2175, %v3768_v34  }
 0x1f9   : > { %v3771_v33 = vpop.permute.xlu1 %1464 }
 0x1fa   : > { %1679 = vperm.xlu2 %2174, %v4402_v21  }
 0x1fb   : > { %v3774_v39 = vpop.permute.xlu2 %1485 }
 0x1fe   : > { %1524 = vperm.xlu0 %2176, %v3347_v18   ;;  %v4407_v18 = vld [vmem:[#allocation25_spill] sm:$0xff] }
 0x1ff   : > { %v3778_v9 = vpop.permute.xlu0 %1682  ;;  %v900_v30 = vrot.slane %v4407_v18, 4 }
 0x200   : > { %1694 = vperm.xlu1 %2175, %v3782_v12  }
 0x201   : > { %v3786_v38 = vpop.permute.xlu1 %1473  ;;  %v3801_v14 = vsel %vm342_vm0, %v4409_v25, %v900_v30  ;;  %v1000_v30 = vrot.slane %v3361_v36, 4  ;;  %v4413_v25 = vld [vmem:[#allocation50_spill] sm:$0xff]  ;;  %v3832_v36 = vsel %vm342_vm0, %v3364_v29, %v1116_v50 }
 0x202   : > { %1688 = vperm.xlu2 %2174, %v3790_v48  }
 0x203   : > { %v3793_v57 = vpop.permute.xlu2 %1494 }
 0x206   : > { %1533 = vperm.xlu0 %2176, %v3404_v16  }
 0x207   : > { %v3797_v62 = vpop.permute.xlu0 %1691 }
 0x208   : > { %4408 = vst [vmem:[#allocation14_spill] sm:$0xff] %v3797_v62  ;;  %1703 = vperm.xlu1 %2175, %v3801_v14   ;;  %v3821_v62 = vsel %vm342_vm0, %v3322_v24, %v1000_v30 }
 0x209   : > { %v3805_v63 = vpop.permute.xlu1 %1482  ;;  %4414 = vst [vmem:[#allocation39_spill] sm:$0xff] %v3821_v62 }
 0x20a   : > { %1697 = vperm.xlu2 %2174, %v3809_v41  }
 0x20b   : > { %v1504_v18 = vpop.permute.xlu2 %1503 }
 0x20e   : > { %1542 = vperm.xlu0 %2176, %v3448_v22  }
 0x20f   : > { %v3813_v16 = vpop.permute.xlu0 %1700 }
 0x210   : > { %4412 = vst [vmem:[#allocation33_spill] sm:$0xff] %v3813_v16  ;;  %1712 = vperm.xlu1 %2175, %v4413_v25   ;;  %v1012_v16 = vrot.slane %v3418_v52, 4  ;;  %v1224_v52 = vrot.slane %v3443_v35, 4 }
 0x211   : > { %v3817_v17 = vpop.permute.xlu1 %1491 }
 0x212   : > { %1706 = vperm.xlu2 %2174, %v3821_v62   ;;  %v3838_v30 = vsel %vm342_vm0, %v3378_v32, %v1012_v16  ;;  %v1578_v62 = vperm.slane %v1504_v18, %v3527_v60  ;;  %v3854_v32 = vsel %vm342_vm0, %v3422_v11, %v1224_v52  ;;  %v1120_v18 = vrot.slane %v3456_v27, 4 }
 0x213   : > { %v3824_v20 = vpop.permute.xlu2 %1512 }
 0x216   : > { %1811 = vperm.xlu0 %2176, %v3482_v43  }
 0x217   : > { %v3828_v22 = vpop.permute.xlu0 %1709 }
 0x218   : > { %1721 = vperm.xlu1 %2175, %v3832_v36  }
 0x219   : > { %v1501_v24 = vpop.permute.xlu1 %1500 }
 0x21a   : > { %v1577_v6 = vperm.slane %v1501_v24, %v3519_v45  ;;  %1715 = vperm.xlu2 %2174, %v3838_v30   ;;  %v1228_v24 = vrot.slane %v3490_v61, 4  ;;  %v1742_v61 = vperm.slane %v3724_v7, %v3527_v60  ;;  %v1552_v7 = vperm.slane %v3705_v54, %v3534_v51 }
 0x21b   : > { %v3843_v43 = vpop.permute.xlu2 %1521 }
 0x21c   : > { %v3846_v29 = vsel %vm1371_vm1, %v1578_v62, %v1577_v6  ;;  %v3862_v62 = vsel %vm342_vm0, %v3431_v55, %v1120_v18  ;;  %v3881_v6 = vsel %vm342_vm0, %v3469_v2, %v1228_v24  ;;  %v4415_v18 = vld [vmem:[#allocation17_spill] sm:$0xff] }
 0x21e   : > { %1826 = vperm.xlu0 %2176, %v3501_v56   ;;  %v1236_v56 = vrot.slane %v3477_v15, 4 }
 0x21f   : > { %v3850_v50 = vpop.permute.xlu0 %1718 }
 0x220   : > { %1730 = vperm.xlu1 %2175, %v3854_v32   ;;  %v3873_v27 = vsel %vm342_vm0, %v3460_v28, %v1236_v56 }
 0x221   : > { %v3858_v16 = vpop.permute.xlu1 %1509 }
 0x222   : > { %1724 = vperm.xlu2 %2174, %v3862_v62  }
 0x223   : > { %v3865_v35 = vpop.permute.xlu2 %1530 }
 0x226   : > { %1835 = vperm.xlu0 %2176, %v4369_v58  }
 0x227   : > { %v3869_v11 = vpop.permute.xlu0 %1727 }
 0x228   : > { %1739 = vperm.xlu1 %2175, %v3873_v27  }
 0x229   : > { %v3877_v55 = vpop.permute.xlu1 %1518 }
 0x22a   : > { %1733 = vperm.xlu2 %2174, %v3881_v6  }
 0x22b   : > { %v3884_v15 = vpop.permute.xlu2 %1539 }
 0x22e   : > { %1844 = vperm.xlu0 %2176, %v3514_v37  }
 0x22f   : > { %v3887_v58 = vpop.permute.xlu0 %1736 }
 0x230   : > { %2178 = vset.pattern.permute.xlu1 %v4377_v19 }
 0x231   : > { %1814 = vperm.xlu1 %2178, %v3643_v31   ;;  %v3891_v28 = vpop.permute.xlu1 %1527  ;;  %v1547_v31 = vperm.slane %v3663_v59, %v3519_v45 }
 0x232   : > { %2177 = vset.pattern.permute.xlu2 %v4377_v19 }
 0x233   : > { %1808 = vperm.xlu2 %2177, %v3655_v42   ;;  %v1550_v42 = vperm.slane %v3757_v40, %v3531_v53 }
 0x234   : > { %v1647_v2 = vpop.permute.xlu2 %1646 }
 0x235   : > { %v1741_v52 = vperm.slane %v1647_v2, %v3519_v45 }
 0x236   : > { %1853 = vperm.xlu0 %2176, %v4415_v18  }
 0x237   : > { %v1743_v37 = vsel %vm1371_vm1, %v1742_v61, %v1741_v52  ;;  %v1554_v61 = vperm.slane %v3771_v33, %v3554_v0 }
 0x238   : > { %v1456_v56 = vpop.permute.xlu0 %1455 }
 0x239   : > { %v1548_v24 = vperm.slane %v1456_v56, %v3527_v60  ;;  %1820 = vperm.xlu1 %2178, %v3682_v44   ;;  %v3904_v19 = vpop.permute.xlu1 %1536  ;;  %v1556_v44 = vperm.slane %v3746_v13, %v3557_v46  ;;  %v4416_v56 = vld [vmem:[#allocation8_spill] sm:$0xff] }
 0x23b   : > { %v1549_v2 = vsel %vm1371_vm1, %v1548_v24, %v1547_v31  ;;  %1817 = vperm.xlu2 %2177, %v3692_v8   ;;  %v1560_v24 = vperm.slane %v3786_v38, %v3685_v26  ;;  %v1565_v38 = vperm.slane %v3805_v63, %v3531_v53  ;;  %v4418_v63 = vld [vmem:[#allocation27_spill] sm:$0xff] }
 0x23c   : > { %v1551_v59 = vsel %vm1375_vm2, %v1550_v42, %v1549_v2  ;;  %v1656_v52 = vpop.permute.xlu2 %1655  ;;  %v4417_v2 = vld [vmem:[#allocation10_spill] sm:$0xff] }
 0x23d   : > { %v1553_v18 = vsel %vm1379_vm3, %v1552_v7, %v1551_v59  ;;  %v1562_v59 = vperm.slane %v3760_v3, %v3519_v45 }
 0x23e   : > { %1862 = vperm.xlu0 %2176, %v4416_v56   ;;  %v1555_v40 = vsel %vm1383_vm4, %v1554_v61, %v1553_v18 }
 0x23f   : > { %v1557_v54 = vsel %vm1387_vm5, %v1556_v44, %v1555_v40  ;;  %v1746_v40 = vperm.slane %v1656_v52, %v3534_v51 }
 0x240   : > { %v1471_v31 = vpop.permute.xlu0 %1470 }
 0x241   : > { %v1558_v8 = vperm.slane %v1471_v31, %v3561_v5  ;;  %1829 = vperm.xlu1 %2178, %v3728_v1   ;;  %v3923_v33 = vpop.permute.xlu1 %1545 }
 0x243   : > { %v1559_v13 = vsel %vm1391_vm6, %v1558_v8, %v1557_v54  ;;  %1823 = vperm.xlu2 %2177, %v3739_v4   ;;  %v1567_v4 = vperm.slane %v3774_v39, %v3534_v51 }
 0x244   : > { %v1561_v42 = vsel %vm1395_vm7, %v1560_v24, %v1559_v13  ;;  %v1662_v7 = vpop.permute.xlu2 %1661  ;;  %v1573_v13 = vperm.slane %v3793_v57, %v3561_v5 }
 0x246   : > { %1871 = vperm.xlu0 %2176, %v4417_v2  }
 0x248   : > { %v1480_v61 = vpop.permute.xlu0 %1479 }
 0x249   : > { %v1563_v1 = vperm.slane %v1480_v61, %v3527_v60  ;;  %1838 = vperm.xlu1 %2178, %v4397_v10   ;;  %v1750_v61 = vperm.slane %v1662_v7, %v3557_v46 }
 0x24a   : > { %v1653_v44 = vpop.permute.xlu1 %1652 }
 0x24b   : > { %v1564_v18 = vsel %vm1371_vm1, %v1563_v1, %v1562_v59  ;;  %v1744_v56 = vperm.slane %v1653_v44, %v3531_v53  ;;  %1832 = vperm.xlu2 %2177, %v4398_v49   ;;  %v1571_v49 = vperm.slane %v3817_v17, %v3557_v46  ;;  %v4419_v44 = vld [vmem:[#allocation13_spill] sm:$0xff] }
 0x24c   : > { %v1566_v3 = vsel %vm1375_vm2, %v1565_v38, %v1564_v18  ;;  %v1671_v54 = vpop.permute.xlu2 %1670 }
 0x24d   : > { %v1745_v10 = vsel %vm1375_vm2, %v1744_v56, %v1743_v37  ;;  %v1568_v31 = vsel %vm1379_vm3, %v1567_v4, %v1566_v3  ;;  %v4420_v3 = vld [vmem:[#allocation11_spill] sm:$0xff] }
 0x24e   : > { %1880 = vperm.xlu0 %2176, %v4418_v63   ;;  %v1747_v8 = vsel %vm1379_vm3, %v1746_v40, %v1745_v10  ;;  %v1756_v10 = vperm.slane %v1671_v54, %v3519_v45 }
 0x250   : > { %v1489_v39 = vpop.permute.xlu0 %1488 }
 0x251   : > { %v1569_v24 = vperm.slane %v1489_v39, %v3554_v0  ;;  %1847 = vperm.xlu1 %2178, %v3768_v34   ;;  %v1752_v34 = vperm.slane %v3754_v23, %v3561_v5 }
 0x252   : > { %v1659_v52 = vpop.permute.xlu1 %1658 }
 0x253   : > { %v1570_v37 = vsel %vm1383_vm4, %v1569_v24, %v1568_v31  ;;  %v1748_v2 = vperm.slane %v1659_v52, %v3554_v0  ;;  %1841 = vperm.xlu2 %2177, %v4402_v21  }
 0x254   : > { %v1572_v59 = vsel %vm1387_vm5, %v1571_v49, %v1570_v37  ;;  %v1680_v1 = vpop.permute.xlu2 %1679 }
 0x255   : > { %v1749_v17 = vsel %vm1383_vm4, %v1748_v2, %v1747_v8  ;;  %v1574_v38 = vsel %vm1391_vm6, %v1573_v13, %v1572_v59  ;;  %v1582_v8 = vperm.slane %v3858_v16, %v3534_v51  ;;  %v1763_v16 = vperm.slane %v3778_v9, %v3554_v0 }
 0x256   : > { %v1751_v57 = vsel %vm1387_vm5, %v1750_v61, %v1749_v17  ;;  %1889 = vperm.xlu0 %2176, %v4419_v44   ;;  %v1588_v2 = vperm.slane %v3877_v55, %v3561_v5  ;;  %v1590_v9 = vperm.slane %v3843_v43, %v3685_v26 }
 0x257   : > { %v1753_v4 = vsel %vm1391_vm6, %v1752_v34, %v1751_v57  ;;  %v4421_v34 = vld [vmem:[#allocation39_spill] sm:$0xff] }
 0x258   : > { %v1498_v18 = vpop.permute.xlu0 %1497 }
 0x259   : > { %v1575_v21 = vperm.slane %v1498_v18, %v3685_v26  ;;  %1856 = vperm.xlu1 %2178, %v3782_v12   ;;  %v1757_v12 = vperm.slane %v3764_v47, %v3527_v60 }
 0x25a   : > { %v1668_v7 = vpop.permute.xlu1 %1667 }
 0x25b   : > { %v1576_v56 = vsel %vm1395_vm7, %v1575_v21, %v1574_v38  ;;  %1850 = vperm.xlu2 %2177, %v3790_v48   ;;  %v1584_v48 = vperm.slane %v3824_v20, %v3554_v0  ;;  %v1758_v24 = vsel %vm1371_vm1, %v1757_v12, %v1756_v10 }
 0x25c   : > { %v1607_v23 = vsel %vm1442_vm8, %v1576_v56, %v1561_v42  ;;  %v1689_v40 = vpop.permute.xlu2 %1688 }
 0x25d   : > { %v1767_v17 = vperm.slane %v1689_v40, %v3561_v5  ;;  %v1593_v40 = vperm.slane %v3891_v28, %v3527_v60 }
 0x25e   : > { %1898 = vperm.xlu0 %2176, %v4420_v3  }
 0x260   : > { %v1507_v31 = vpop.permute.xlu0 %1506 }
 0x261   : > { %v1580_v63 = vperm.slane %v1507_v31, %v3531_v53  ;;  %1865 = vperm.xlu1 %2178, %v3801_v14   ;;  %v1761_v14 = vperm.slane %v1680_v1, %v3534_v51  ;;  %v1595_v31 = vperm.slane %v3865_v35, %v3531_v53 }
 0x262   : > { %v1677_v39 = vpop.permute.xlu1 %1676 }
 0x263   : > { %v1581_v42 = vsel %vm1375_vm2, %v1580_v63, %v3846_v29  ;;  %v1759_v54 = vperm.slane %v1677_v39, %v3531_v53  ;;  %1859 = vperm.xlu2 %2177, %v3809_v41  }
 0x264   : > { %v1583_v47 = vsel %vm1379_vm3, %v1582_v8, %v1581_v42  ;;  %v1698_v49 = vpop.permute.xlu2 %1697 }
 0x265   : > { %v1760_v52 = vsel %vm1375_vm2, %v1759_v54, %v1758_v24  ;;  %v1585_v20 = vsel %vm1383_vm4, %v1584_v48, %v1583_v47  ;;  %v1772_v28 = vperm.slane %v1698_v49, %v3527_v60 }
 0x266   : > { %v1762_v29 = vsel %vm1379_vm3, %v1761_v14, %v1760_v52  ;;  %v1599_v14 = vperm.slane %v3904_v19, %v3554_v0 }
 0x267   : > { %v1764_v13 = vsel %vm1383_vm4, %v1763_v16, %v1762_v29  ;;  %v1780_v29 = vperm.slane %v3828_v22, %v3557_v46 }
 0x268   : > { %v1516_v37 = vpop.permute.xlu0 %1515 }
 0x269   : > { %v1586_v41 = vperm.slane %v1516_v37, %v3557_v46  ;;  %1874 = vperm.xlu1 %2178, %v4413_v25   ;;  %v4422_v25 = vld [vmem:[#allocation14_spill] sm:$0xff] }
 0x26a   : > { %v1686_v61 = vpop.permute.xlu1 %1685  ;;  %v1769_v44 = vperm.slane %v4422_v25, %v3685_v26 }
 0x26b   : > { %v1587_v59 = vsel %vm1387_vm5, %v1586_v41, %v1585_v20  ;;  %v1765_v1 = vperm.slane %v1686_v61, %v3557_v46  ;;  %1868 = vperm.xlu2 %2177, %v4421_v34   ;;  %v1605_v61 = vperm.slane %v3923_v33, %v3685_v26 }
 0x26c   : > { %v1589_v38 = vsel %vm1391_vm6, %v1588_v2, %v1587_v59  ;;  %v1707_v57 = vpop.permute.xlu2 %1706 }
 0x26d   : > { %v1591_v55 = vsel %vm1395_vm7, %v1590_v9, %v1589_v38  ;;  %v1766_v18 = vsel %vm1387_vm5, %v1765_v1, %v1764_v13  ;;  %v1778_v16 = vperm.slane %v1707_v57, %v3554_v0 }
 0x26e   : > { %v1768_v43 = vsel %vm1391_vm6, %v1767_v17, %v1766_v18  ;;  %v1608_v21 = vsel %vm1444_vm9, %v1591_v55, %v1607_v23  ;;  %v1754_v23 = vperm.slane %v1668_v7, %v3685_v26  ;;  %v4423_v7 = vld [vmem:[#allocation33_spill] sm:$0xff] }
 0x26f   : > { %v1770_v56 = vsel %vm1395_vm7, %v1769_v44, %v1768_v43  ;;  %v1774_v24 = vperm.slane %v4423_v7, %v3531_v53  ;;  %v1786_v44 = vperm.slane %v3850_v50, %v3519_v45  ;;  %v1791_v43 = vperm.slane %v3869_v11, %v3534_v51 }
 0x270   : > { %v1525_v3 = vpop.permute.xlu0 %1524  ;;  %v1755_v42 = vsel %vm1395_vm7, %v1754_v23, %v1753_v4  ;;  %v1797_v11 = vperm.slane %v3887_v58, %v3561_v5 }
 0x271   : > { %v1592_v10 = vperm.slane %v1525_v3, %v3519_v45  ;;  %1883 = vperm.xlu1 %2178, %v3832_v36  }
 0x272   : > { %v1695_v63 = vpop.permute.xlu1 %1694 }
 0x273   : > { %v1594_v12 = vsel %vm1371_vm1, %v1593_v40, %v1592_v10  ;;  %1877 = vperm.xlu2 %2177, %v3838_v30   ;;  %v1771_v48 = vperm.slane %v1695_v63, %v3519_v45  ;;  %v1801_v30 = vsel %vm1442_vm8, %v1770_v56, %v1755_v42 }
 0x274   : > { %v1716_v8 = vpop.permute.xlu2 %1715  ;;  %v1596_v39 = vsel %vm1375_vm2, %v1595_v31, %v1594_v12 }
 0x275   : > { %v1773_v54 = vsel %vm1371_vm1, %v1772_v28, %v1771_v48  ;;  %v1784_v34 = vperm.slane %v1716_v8, %v3685_v26 }
 0x278   : > { %v1534_v36 = vpop.permute.xlu0 %1533 }
 0x279   : > { %v1597_v35 = vperm.slane %v1534_v36, %v3534_v51  ;;  %1892 = vperm.xlu1 %2178, %v3854_v32   ;;  %v1775_v32 = vsel %vm1375_vm2, %v1774_v24, %v1773_v54 }
 0x27a   : > { %v1704_v47 = vpop.permute.xlu1 %1703 }
 0x27b   : > { %v1598_v49 = vsel %vm1379_vm3, %v1597_v35, %v1596_v39  ;;  %v1776_v4 = vperm.slane %v1704_v47, %v3534_v51  ;;  %1886 = vperm.xlu2 %2177, %v3862_v62   ;;  %v1601_v62 = vperm.slane %v3884_v15, %v3557_v46 }
 0x27c   : > { %v1600_v52 = vsel %vm1383_vm4, %v1599_v14, %v1598_v49  ;;  %v1725_v20 = vpop.permute.xlu2 %1724 }
 0x27d   : > { %v1777_v13 = vsel %vm1379_vm3, %v1776_v4, %v1775_v32  ;;  %v1602_v22 = vsel %vm1387_vm5, %v1601_v62, %v1600_v52  ;;  %v1789_v18 = vperm.slane %v1725_v20, %v3531_v53 }
 0x27e   : > { %v1779_v19 = vsel %vm1383_vm4, %v1778_v16, %v1777_v13 }
 0x27f   : > { %v1781_v37 = vsel %vm1387_vm5, %v1780_v29, %v1779_v19 }
 0x280   : > { %v1543_v41 = vpop.permute.xlu0 %1542 }
 0x281   : > { %v1603_v2 = vperm.slane %v1543_v41, %v3561_v5  ;;  %1901 = vperm.xlu1 %2178, %v3873_v27  }
 0x282   : > { %v1713_v9 = vpop.permute.xlu1 %1712 }
 0x283   : > { %v1604_v59 = vsel %vm1391_vm6, %v1603_v2, %v1602_v22  ;;  %v1782_v1 = vperm.slane %v1713_v9, %v3561_v5  ;;  %1895 = vperm.xlu2 %2177, %v3881_v6  }
 0x284   : > { %v1606_v15 = vsel %vm1395_vm7, %v1605_v61, %v1604_v59  ;;  %v1734_v17 = vpop.permute.xlu2 %1733 }
 0x285   : > { %v1609_v38 = vsel %vm1446_vm10, %v1606_v15, %v1608_v21  ;;  %v1783_v27 = vsel %vm1391_vm6, %v1782_v1, %v1781_v37  ;;  %v1795_v23 = vperm.slane %v1734_v17, %v3557_v46 }
 0x286   : > { %2082 = vst.msk [vmem:[%s3749_s27 + $0x4] sm:$0xf] %vm1449_vm11, %v1609_v38  ;;  %v1785_v33 = vsel %vm1395_vm7, %v1784_v34, %v1783_v27 }
 0x287   : > { %v1802_v57 = vsel %vm1444_vm9, %v1785_v33, %v1801_v30 }
 0x288   : > { %v1812_v6 = vpop.permute.xlu0 %1811 }
 0x289   : > { %v1904_v3 = vperm.slane %v1812_v6, %v3527_v60 }
 0x28a   : > { %v1722_v25 = vpop.permute.xlu1 %1721 }
 0x28b   : > { %v1787_v55 = vperm.slane %v1722_v25, %v3527_v60 }
 0x28d   : > { %v1788_v21 = vsel %vm1371_vm1, %v1787_v55, %v1786_v44  ;;  %v1809_v56 = vpop.permute.xlu2 %1808 }
 0x28e   : > { %v1790_v40 = vsel %vm1375_vm2, %v1789_v18, %v1788_v21  ;;  %v1903_v10 = vperm.slane %v1809_v56, %v3519_v45 }
 0x28f   : > { %v1792_v50 = vsel %vm1379_vm3, %v1791_v43, %v1790_v40 }
 0x290   : > { %v1905_v31 = vsel %vm1371_vm1, %v1904_v3, %v1903_v10  ;;  %v4088_v7 = vpop.permute.xlu0 %1826 }
 0x292   : > { %v1731_v63 = vpop.permute.xlu1 %1730 }
 0x293   : > { %v1793_v12 = vperm.slane %v1731_v63, %v3554_v0 }
 0x295   : > { %v1794_v8 = vsel %vm1383_vm4, %v1793_v12, %v1792_v50  ;;  %v1818_v39 = vpop.permute.xlu2 %1817 }
 0x296   : > { %v1796_v48 = vsel %vm1387_vm5, %v1795_v23, %v1794_v8  ;;  %v1908_v14 = vperm.slane %v1818_v39, %v3534_v51 }
 0x297   : > { %v1798_v28 = vsel %vm1391_vm6, %v1797_v11, %v1796_v48 }
 0x298   : > { %v1836_v16 = vpop.permute.xlu0 %1835 }
 0x29a   : > { %v1740_v42 = vpop.permute.xlu1 %1739 }
 0x29b   : > { %v1799_v36 = vperm.slane %v1740_v42, %v3685_v26 }
 0x29d   : > { %v1800_v54 = vsel %vm1395_vm7, %v1799_v36, %v1798_v28  ;;  %v4083_v35 = vpop.permute.xlu2 %1823 }
 0x29e   : > { %v1803_v30 = vsel %vm1446_vm10, %v1800_v54, %v1802_v57  ;;  %v1919_v57 = vperm.slane %v1836_v16, %v3527_v60 }
 0x29f   : > { %2083 = vst.msk [vmem:[%s3749_s27 + $0x8] sm:$0xf] %vm1449_vm11, %v1803_v30 }
 0x2a0   : > { %v1845_v19 = vpop.permute.xlu0 %1844 }
 0x2a1   : > { %v1925_v23 = vperm.slane %v1845_v19, %v3554_v0 }
 0x2a3   : > { %v1815_v58 = vpop.permute.xlu1 %1814 }
 0x2a4   : > { %v1906_v24 = vperm.slane %v1815_v58, %v3531_v53 }
 0x2a5   : > { %v1833_v49 = vpop.permute.xlu2 %1832 }
 0x2a6   : > { %v1907_v47 = vsel %vm1375_vm2, %v1906_v24, %v1905_v31  ;;  %v1918_v27 = vperm.slane %v1833_v49, %v3519_v45  ;;  %v1912_v49 = vperm.slane %v4083_v35, %v3557_v46 }
 0x2a7   : > { %v1909_v4 = vsel %vm1379_vm3, %v1908_v14, %v1907_v47 }
 0x2a8   : > { %v4098_v41 = vpop.permute.xlu0 %1853  ;;  %v1920_v44 = vsel %vm1371_vm1, %v1919_v57, %v1918_v27 }
 0x2ab   : > { %v1821_v52 = vpop.permute.xlu1 %1820 }
 0x2ac   : > { %v1910_v32 = vperm.slane %v1821_v52, %v3554_v0 }
 0x2ad   : > { %v1842_v29 = vpop.permute.xlu2 %1841 }
 0x2ae   : > { %v1911_v20 = vsel %vm1383_vm4, %v1910_v32, %v1909_v4  ;;  %v1923_v56 = vperm.slane %v1842_v29, %v3534_v51 }
 0x2af   : > { %v1913_v32 = vsel %vm1387_vm5, %v1912_v49, %v1911_v20 }
 0x2b0   : > { %v1863_v22 = vpop.permute.xlu0 %1862 }
 0x2b1   : > { %v1936_v10 = vperm.slane %v1863_v22, %v3531_v53 }
 0x2b3   : > { %v4096_v13 = vpop.permute.xlu1 %1829 }
 0x2b4   : > { %v1916_v29 = vperm.slane %v4096_v13, %v3685_v26 }
 0x2b5   : > { %v1851_v37 = vpop.permute.xlu2 %1850 }
 0x2b6   : > { %v1929_v14 = vperm.slane %v1851_v37, %v3561_v5 }
 0x2b8   : > { %v1872_v1 = vpop.permute.xlu0 %1871 }
 0x2bb   : > { %v1839_v62 = vpop.permute.xlu1 %1838 }
 0x2bc   : > { %v1921_v33 = vperm.slane %v1839_v62, %v3531_v53  ;;  %v1914_v62 = vperm.slane %v4088_v7, %v3561_v5 }
 0x2bd   : > { %v1860_v61 = vpop.permute.xlu2 %1859 }
 0x2be   : > { %v1934_v6 = vperm.slane %v1860_v61, %v3527_v60  ;;  %v1922_v43 = vsel %vm1375_vm2, %v1921_v33, %v1920_v44 }
 0x2bf   : > { %v1924_v63 = vsel %vm1379_vm3, %v1923_v56, %v1922_v43 }
 0x2c0   : > { %v1881_v38 = vpop.permute.xlu0 %1880  ;;  %v1926_v48 = vsel %vm1383_vm4, %v1925_v23, %v1924_v63 }
 0x2c1   : > { %v1948_v50 = vperm.slane %v1881_v38, %v3519_v45 }
 0x2c3   : > { %v1848_v2 = vpop.permute.xlu1 %1847 }
 0x2c4   : > { %v1927_v12 = vperm.slane %v1848_v2, %v3557_v46  ;;  %v1915_v2 = vsel %vm1391_vm6, %v1914_v62, %v1913_v32 }
 0x2c5   : > { %v1869_v59 = vpop.permute.xlu2 %1868  ;;  %v1917_v7 = vsel %vm1395_vm7, %v1916_v29, %v1915_v2 }
 0x2c6   : > { %v1928_v28 = vsel %vm1387_vm5, %v1927_v12, %v1926_v48 }
 0x2c7   : > { %v1930_v16 = vsel %vm1391_vm6, %v1929_v14, %v1928_v28 }
 0x2c8   : > { %v1890_v31 = vpop.permute.xlu0 %1889 }
 0x2c9   : > { %v1953_v54 = vperm.slane %v1890_v31, %v3534_v51 }
 0x2cb   : > { %v1857_v9 = vpop.permute.xlu1 %1856 }
 0x2cc   : > { %v1933_v25 = vperm.slane %v1857_v9, %v3519_v45  ;;  %v1940_v45 = vperm.slane %v1869_v59, %v3554_v0 }
 0x2cd   : > { %v1878_v15 = vpop.permute.xlu2 %1877 }
 0x2ce   : > { %v1935_v3 = vsel %vm1371_vm1, %v1934_v6, %v1933_v25 }
 0x2cf   : > { %v1937_v11 = vsel %vm1375_vm2, %v1936_v10, %v1935_v3 }
 0x2d0   : > { %v1899_v19 = vpop.permute.xlu0 %1898 }
 0x2d3   : > { %v1866_v34 = vpop.permute.xlu1 %1865 }
 0x2d4   : > { %v1938_v40 = vperm.slane %v1866_v34, %v3534_v51  ;;  %v1931_v51 = vperm.slane %v4098_v41, %v3685_v26  ;;  %v1946_v41 = vperm.slane %v1878_v15, %v3685_v26 }
 0x2d5   : > { %v1887_v55 = vpop.permute.xlu2 %1886 }
 0x2d6   : > { %v1939_v8 = vsel %vm1379_vm3, %v1938_v40, %v1937_v11  ;;  %v1951_v39 = vperm.slane %v1887_v55, %v3531_v53  ;;  %v1942_v53 = vperm.slane %v1872_v1, %v3557_v46  ;;  %v1932_v20 = vsel %vm1395_vm7, %v1931_v51, %v1930_v16 }
 0x2d7   : > { %v1941_v30 = vsel %vm1383_vm4, %v1940_v45, %v1939_v8  ;;  %v1963_v1 = vsel %vm1442_vm8, %v1932_v20, %v1917_v7 }
 0x2d8   : > { %v1943_v52 = vsel %vm1387_vm5, %v1942_v53, %v1941_v30 }
 0x2db   : > { %v1875_v17 = vpop.permute.xlu1 %1874 }
 0x2dc   : > { %v1944_v58 = vperm.slane %v1875_v17, %v3561_v5 }
 0x2dd   : > { %v1896_v47 = vpop.permute.xlu2 %1895 }
 0x2de   : > { %v1945_v37 = vsel %vm1391_vm6, %v1944_v58, %v1943_v52  ;;  %v1957_v35 = vperm.slane %v1896_v47, %v3557_v46  ;;  %v1959_v46 = vperm.slane %v1899_v19, %v3561_v5 }
 0x2df   : > { %v1947_v61 = vsel %vm1395_vm7, %v1946_v41, %v1945_v37 }
 0x2e0   : > { %v1964_v34 = vsel %vm1444_vm9, %v1947_v61, %v1963_v1 }
 0x2e3   : > { %v1884_v18 = vpop.permute.xlu1 %1883 }
 0x2e4   : > { %v1949_v21 = vperm.slane %v1884_v18, %v3527_v60 }
 0x2e6   : > { %v1950_v60 = vsel %vm1371_vm1, %v1949_v21, %v1948_v50 }
 0x2e7   : > { %v1952_v42 = vsel %vm1375_vm2, %v1951_v39, %v1950_v60 }
 0x2e8   : > { %v1954_v4 = vsel %vm1379_vm3, %v1953_v54, %v1952_v42 }
 0x2eb   : > { %v1893_v36 = vpop.permute.xlu1 %1892 }
 0x2ec   : > { %v1955_v24 = vperm.slane %v1893_v36, %v3554_v0 }
 0x2ee   : > { %v1956_v0 = vsel %vm1383_vm4, %v1955_v24, %v1954_v4 }
 0x2ef   : > { %v1958_v13 = vsel %vm1387_vm5, %v1957_v35, %v1956_v0 }
 0x2f0   : > { %v1960_v59 = vsel %vm1391_vm6, %v1959_v46, %v1958_v13 }
 0x2f3   : > { %v1902_v22 = vpop.permute.xlu1 %1901 }
 0x2f4   : > { %v1961_v9 = vperm.slane %v1902_v22, %v3685_v26 }
 0x2f6   : > { %v1962_v15 = vsel %vm1395_vm7, %v1961_v9, %v1960_v59 }
 0x2f7   : > { %v1965_v5 = vsel %vm1446_vm10, %v1962_v15, %v1964_v34 }
 0x2f8   : > { %2084 = vst.msk [vmem:[%s3749_s27 + $0xc] sm:$0xf] %vm1449_vm11, %v1965_v5 }
 0x2f9   : > { %2237 = shalt.err (!%p2234_p13)
}
 0x2fa   : > { %s2307_s5 = smov 64   ;;  %s2308_s23 = smov 4  }
 0x2fb   : > { %2094 = dma.vmem_to_hbm [thread:$0]  (%p2370_p9), %s4156_s2, 256, %s1986_s3, %s1970_s4, %s2307_s5, %s2307_s5, %s2308_s23  }
 0x2fc PF: > { %s2000_s24 = sand.u32 1, %s2272_s6   ;;  %p2101_p0 = pnand %p2075_p12, %p2377_p11 }
 0x2fd   : > { %s2001_s25 = scalar_lea.sflag [#allocation4], %s2000_s24 }
 0x2fe   : > { %p2102_p1 = pneg %p2101_p0 }
 0x300   : > { %2267 = dma.done.wait (%p2102_p1), %s2001_s25, 256  }
 0x301   : > { %2269 = vsyncadd (%p2102_p1), %s2001_s25, 4294967040  ;;  %s17_s11 = sadd.s32 1, %s2292_s11   ;;  %s4424_s6 = smov %s2276_s7 }
 0x302   : > { %p14_p2 = scmp.ge.s32.totalorder %s17_s11, 4   ;;  %s4425_s7 = smov %s2280_s8 }
 0x303   : > { %s4426_s8 = smov %s2375_s20  ;;  %s4427_s9 = smov %s2288_s10 }
 0x304   : > { %s4428_s10 = smov %s4430_s14  ;;  %16 = sbr.rel (!%p14_p2) target bundleno = 6 (0x6), region = 72 }
 0x309   :  { %2007 = vsyncpa [#allocation3], 1 }
 0x30a   :  { %2009 = vsyncpa [#allocation3 + $0x1], 1 }
 0x30b   :  { %2010 = vsyncpa [#allocation4], 1 }
 0x30c   :  { %2012 = vsyncpa [#allocation4 + $0x1], 1 }

</bundles_post_ra>
